<compile_context>
chip_gen: v7x
topology: tpu7x:2x2x1
jax: 0.10.0
libtpu: 0.0.40
codegen_flags: <defaults>
</compile_context>

<pallas_src>
import numpy as np
import jax
import jax.numpy as jnp
from jax import lax
from jax.experimental import pallas as pl
from jax.experimental.pallas import tpu as pltpu


# ----------------------------------------------------------------------------
# Static network geometry (LeNet on 3x32x32 input)
# ----------------------------------------------------------------------------
K = 5                        # conv kernel size
C1_IN, C1_OUT = 3, 6
C2_IN, C2_OUT = 6, 16
H_IN, W_IN = 32, 32
OH1, OW1 = 28, 28            # conv1 output
PH1, PW1 = 14, 14            # pool1 output
OH2, OW2 = 10, 10            # conv2 output
PH2, PW2 = 5, 5              # pool2 output
NFC1, NFC2, NOUT = 120, 84, 10

L_X = W_IN * C1_IN           # 96   x lanes        (w*3 + c)
L_C1 = OW1 * C1_OUT          # 168  conv1 lanes    (w*6 + c)
L_P1 = PW1 * C1_OUT          # 84   pool1 lanes    (x*6 + c)
L_C2 = OW2 * C2_OUT          # 160  conv2 lanes    (w*16 + c)
L_P2 = PW2 * C2_OUT          # 80   pool2 lanes    (x*16 + c)


# ----------------------------------------------------------------------------
# Fused kernel: conv1 -> pool1 -> conv2 -> pool2 -> fc1 -> fc2 -> fc3
# (one image per grid step; everything lives in vregs, no scratch)
# ----------------------------------------------------------------------------
def _lenet_kernel(x_ref, w1_ref, s1e_ref, s1o_ref, p1e_ref, p1o_ref, b1_ref,
                  w2_ref, s2e_ref, s2o_ref, p2e_ref, p2o_ref, b2_ref,
                  w3_ref, b3_ref, w4_ref, b4_ref, w5_ref, b5_ref,
                  o_ref):
    f32 = jnp.float32

    # ---- conv1: 5 accumulated banded matmuls, (28, 96) @ (96, 168) ----------
    acc1 = jnp.dot(x_ref[0:OH1, :], w1_ref[0], preferred_element_type=f32)
    for kh in range(1, K):
        acc1 = acc1 + jnp.dot(x_ref[kh:kh + OH1, :], w1_ref[kh],
                              preferred_element_type=f32)          # (28, 168)

    # ---- maxpool1 2x2/2 via selection matmuls, then bias + ReLU -------------
    hm1 = jnp.maximum(jnp.dot(s1e_ref[...], acc1, preferred_element_type=f32),
                      jnp.dot(s1o_ref[...], acc1, preferred_element_type=f32))
    pool1 = jnp.maximum(jnp.dot(hm1, p1e_ref[...], preferred_element_type=f32),
                        jnp.dot(hm1, p1o_ref[...], preferred_element_type=f32))
    act1 = jnp.maximum(pool1 + b1_ref[...], 0.0)                   # (14, 84)

    # ---- conv2: 5 accumulated banded matmuls, (10, 84) @ (84, 160) ----------
    acc2 = jnp.dot(act1[0:OH2, :], w2_ref[0], preferred_element_type=f32)
    for kh in range(1, K):
        acc2 = acc2 + jnp.dot(act1[kh:kh + OH2, :], w2_ref[kh],
                              preferred_element_type=f32)          # (10, 160)

    # ---- maxpool2 2x2/2 via selection matmuls, then bias + ReLU -------------
    hm2 = jnp.maximum(jnp.dot(s2e_ref[...], acc2, preferred_element_type=f32),
                      jnp.dot(s2o_ref[...], acc2, preferred_element_type=f32))
    pool2 = jnp.maximum(jnp.dot(hm2, p2e_ref[...], preferred_element_type=f32),
                        jnp.dot(hm2, p2o_ref[...], preferred_element_type=f32))
    act2 = jnp.maximum(pool2 + b2_ref[...], 0.0)                   # (5, 80)

    # ---- fc1: flatten folded into the weights -> 5 accumulated matmuls ------
    h = jnp.dot(act2[0:1, :], w3_ref[0], preferred_element_type=f32)
    for y in range(1, PH2):
        h = h + jnp.dot(act2[y:y + 1, :], w3_ref[y],
                        preferred_element_type=f32)                # (1, 120)
    h = jnp.maximum(h + b3_ref[...], 0.0)

    # ---- fc2 / fc3 ----------------------------------------------------------
    h = jnp.maximum(jnp.dot(h, w4_ref[...], preferred_element_type=f32)
                    + b4_ref[...], 0.0)                            # (1, 84)
    out = jnp.dot(h, w5_ref[...], preferred_element_type=f32) + b5_ref[...]
    o_ref[...] = out.astype(o_ref.dtype)                           # (1, 10)


# ----------------------------------------------------------------------------
# Host-side constant construction (tiny; fused/constant-folded by XLA)
# ----------------------------------------------------------------------------
def _banded_conv_weights(w, in_w, out_w):
    """w: (OC, IC, K, K) -> (K, in_w*IC, out_w*OC) Toeplitz-along-W bands."""
    oc, ic, kh, kw = w.shape
    T = np.zeros((kw, in_w, out_w), np.float32)
    for k in range(kw):
        for ow in range(out_w):
            T[k, ow + k, ow] = 1.0
    wb = jnp.einsum("oihk,kaw->haiwo", w, jnp.asarray(T))
    return wb.reshape(kh, in_w * ic, out_w * oc)


def _pool_row_selectors(n_out):
    """(n_out, 2*n_out) even/odd row pickers."""
    se = np.zeros((n_out, 2 * n_out), np.float32)
    so = np.zeros((n_out, 2 * n_out), np.float32)
    se[np.arange(n_out), 2 * np.arange(n_out)] = 1.0
    so[np.arange(n_out), 2 * np.arange(n_out) + 1] = 1.0
    return jnp.asarray(se), jnp.asarray(so)


def _pool_lane_selectors(n_out, c):
    """(2*n_out*c, n_out*c) even/odd w-group compactors on (w, c)-packed lanes."""
    e = np.zeros((2 * n_out, n_out), np.float32)
    o = np.zeros((2 * n_out, n_out), np.float32)
    e[2 * np.arange(n_out), np.arange(n_out)] = 1.0
    o[2 * np.arange(n_out) + 1, np.arange(n_out)] = 1.0
    eye = np.eye(c, dtype=np.float32)
    return jnp.asarray(np.kron(e, eye)), jnp.asarray(np.kron(o, eye))


def _replicated_spec(arr):
    nd = arr.ndim
    return pl.BlockSpec(arr.shape, lambda b, _n=nd: (0,) * _n)


def lenet_forward(params, x):
    """x: (B, 3, 32, 32) NCHW float32 -> logits (B, 10)."""
    B = x.shape[0]
    f32 = jnp.float32

    # Input: NCHW -> (B, H, W*C) with (w, c) packed on lanes.
    x3 = jnp.transpose(x.astype(f32), (0, 2, 3, 1)).reshape(B, H_IN, L_X)

    # Banded conv weights, one (in_lanes, out_lanes) band per kh.
    w1b = _banded_conv_weights(params["w1"].astype(f32), W_IN, OW1)  # (5, 96, 168)
    w2b = _banded_conv_weights(params["w2"].astype(f32), PW1, OW2)   # (5, 84, 160)

    # Constant 0/1 pooling selectors (row pickers / lane compactors).
    s1e, s1o = _pool_row_selectors(PH1)            # (14, 28)
    p1e, p1o = _pool_lane_selectors(PW1, C1_OUT)   # (168, 84)
    s2e, s2o = _pool_row_selectors(PH2)            # (5, 10)
    p2e, p2o = _pool_lane_selectors(PW2, C2_OUT)   # (160, 80)

    # Biases tiled to the lane-packed layouts.
    b1t = jnp.tile(params["b1"].astype(f32), PW1).reshape(1, L_P1)   # (1, 84)
    b2t = jnp.tile(params["b2"].astype(f32), PW2).reshape(1, L_P2)   # (1, 80)

    # fc1 with PyTorch's NCHW flatten (c*25 + y*5 + x) folded in:
    # w3s[y, x*16+oc, n] = W3[n, oc*25 + y*5 + x]
    w3s = (params["w3"].astype(f32)
           .reshape(NFC1, C2_OUT, PH2, PW2)
           .transpose(2, 3, 1, 0)
           .reshape(PH2, L_P2, NFC1))                                # (5, 80, 120)
    b3 = params["b3"].astype(f32).reshape(1, NFC1)
    w4t = params["w4"].astype(f32).T                                 # (120, 84)
    b4 = params["b4"].astype(f32).reshape(1, NFC2)
    w5t = params["w5"].astype(f32).T                                 # (84, 10)
    b5 = params["b5"].astype(f32).reshape(1, NOUT)

    inputs = (x3, w1b, s1e, s1o, p1e, p1o, b1t,
              w2b, s2e, s2o, p2e, p2o, b2t,
              w3s, b3, w4t, b4, w5t, b5)

    in_specs = [pl.BlockSpec((None, H_IN, L_X), lambda b: (b, 0, 0))]
    in_specs += [_replicated_spec(a) for a in inputs[1:]]

    out = pl.pallas_call(
        _lenet_kernel,
        grid=(B,),
        out_shape=jax.ShapeDtypeStruct((B, 1, NOUT), f32),
        in_specs=in_specs,
        out_specs=pl.BlockSpec((None, 1, NOUT), lambda b: (b, 0, 0)),
        compiler_params=pltpu.CompilerParams(
            dimension_semantics=("parallel",)),
    )(*inputs)
    return out.reshape(B, NOUT)


# ----------------------------------------------------------------------------
# Pure-JAX reference (mirrors the PyTorch module) for a correctness check
# ----------------------------------------------------------------------------
def _lenet_reference(params, x):
    f32 = jnp.float32
    x = x.astype(f32)
    dn1 = lax.conv_dimension_numbers(x.shape, params["w1"].shape,
                                     ("NCHW", "OIHW", "NCHW"))
    y = lax.conv_general_dilated(x, params["w1"].astype(f32), (1, 1), "VALID",
                                 dimension_numbers=dn1,
                                 precision=lax.Precision.HIGHEST)
    y = jnp.maximum(y + params["b1"].astype(f32).reshape(1, -1, 1, 1), 0.0)
    y = lax.reduce_window(y, -jnp.inf, lax.max, (1, 1, 2, 2), (1, 1, 2, 2), "VALID")
    dn2 = lax.conv_dimension_numbers(y.shape, params["w2"].shape,
                                     ("NCHW", "OIHW", "NCHW"))
    y = lax.conv_general_dilated(y, params["w2"].astype(f32), (1, 1), "VALID",
                                 dimension_numbers=dn2,
                                 precision=lax.Precision.HIGHEST)
    y = jnp.maximum(y + params["b2"].astype(f32).reshape(1, -1, 1, 1), 0.0)
    y = lax.reduce_window(y, -jnp.inf, lax.max, (1, 1, 2, 2), (1, 1, 2, 2), "VALID")
    y = y.reshape(y.shape[0], -1)
    y = jnp.maximum(y @ params["w3"].astype(f32).T + params["b3"], 0.0)
    y = jnp.maximum(y @ params["w4"].astype(f32).T + params["b4"], 0.0)
    return y @ params["w5"].astype(f32).T + params["b5"]


# ----------------------------------------------------------------------------
# Deterministic PyTorch-style parameter init
# ----------------------------------------------------------------------------
def init_params(key):
    ks = jax.random.split(key, 10)

    def u(k, shape, fan_in):
        bound = 1.0 / float(fan_in) ** 0.5
        return jax.random.uniform(k, shape, jnp.float32, -bound, bound)

    return {
        "w1": u(ks[0], (6, 3, 5, 5), 3 * 25),   "b1": u(ks[1], (6,), 3 * 25),
        "w2": u(ks[2], (16, 6, 5, 5), 6 * 25),  "b2": u(ks[3], (16,), 6 * 25),
        "w3": u(ks[4], (120, 400), 400),        "b3": u(ks[5], (120,), 400),
        "w4": u(ks[6], (84, 120), 120),         "b4": u(ks[7], (84,), 120),
        "w5": u(ks[8], (10, 84), 84),           "b5": u(ks[9], (10,), 84),
    }


if __name__ == "__main__":
    key = jax.random.PRNGKey(0)
    pkey, xkey = jax.random.split(key)
    params = init_params(pkey)
    # LeNet's 16*5*5 flatten requires 3x32x32 input; batch kept small.
    x = jax.random.normal(xkey, (2, 3, 32, 32), dtype=jnp.float32)

    logits = jax.jit(lenet_forward)(params, x)
    logits = jax.block_until_ready(logits)
    assert logits.shape == (2, 10) and logits.dtype == jnp.float32

    ref = jax.block_until_ready(jax.jit(_lenet_reference)(params, x))
    np.testing.assert_allclose(np.asarray(logits), np.asarray(ref),
                               rtol=2e-2, atol=2e-2)
    print("KERNEL_OK")
</pallas_src>

<mosaic_0001>
module attributes {stable_mosaic.version = 11 : i64} {
  func.func @_lenet_kernel(%arg0: i32, %arg1: memref<1x32x96xf32, #tpu.memory_space<vmem>>, %arg2: memref<5x96x168xf32, #tpu.memory_space<vmem>>, %arg3: memref<14x28xf32, #tpu.memory_space<vmem>>, %arg4: memref<14x28xf32, #tpu.memory_space<vmem>>, %arg5: memref<168x84xf32, #tpu.memory_space<vmem>>, %arg6: memref<168x84xf32, #tpu.memory_space<vmem>>, %arg7: memref<1x84xf32, #tpu.memory_space<vmem>>, %arg8: memref<5x84x160xf32, #tpu.memory_space<vmem>>, %arg9: memref<5x10xf32, #tpu.memory_space<vmem>>, %arg10: memref<5x10xf32, #tpu.memory_space<vmem>>, %arg11: memref<160x80xf32, #tpu.memory_space<vmem>>, %arg12: memref<160x80xf32, #tpu.memory_space<vmem>>, %arg13: memref<1x80xf32, #tpu.memory_space<vmem>>, %arg14: memref<5x80x120xf32, #tpu.memory_space<vmem>>, %arg15: memref<1x120xf32, #tpu.memory_space<vmem>>, %arg16: memref<120x84xf32, #tpu.memory_space<vmem>>, %arg17: memref<1x84xf32, #tpu.memory_space<vmem>>, %arg18: memref<84x10xf32, #tpu.memory_space<vmem>>, %arg19: memref<1x10xf32, #tpu.memory_space<vmem>>, %arg20: memref<1x1x10xf32, #tpu.memory_space<vmem>>) attributes {dimension_semantics = [#tpu.dimension_semantics<parallel>], iteration_bounds = array<i64: 2>, scalar_prefetch = 0 : i64, scratch_operands = 0 : i64, tpu.core_type = #tpu.core_type<tc>, window_params = [{transform_indices = @transform_0, window_bounds = array<i64: 1, 32, 96>}, {pipeline_mode = #tpu.pipeline_mode<synchronous>, transform_indices = @transform_1, window_bounds = array<i64: 5, 96, 168>}, {pipeline_mode = #tpu.pipeline_mode<synchronous>, transform_indices = @transform_2, window_bounds = array<i64: 14, 28>}, {pipeline_mode = #tpu.pipeline_mode<synchronous>, transform_indices = @transform_3, window_bounds = array<i64: 14, 28>}, {pipeline_mode = #tpu.pipeline_mode<synchronous>, transform_indices = @transform_4, window_bounds = array<i64: 168, 84>}, {pipeline_mode = #tpu.pipeline_mode<synchronous>, transform_indices = @transform_5, window_bounds = array<i64: 168, 84>}, {pipeline_mode = #tpu.pipeline_mode<synchronous>, transform_indices = @transform_6, window_bounds = array<i64: 1, 84>}, {pipeline_mode = #tpu.pipeline_mode<synchronous>, transform_indices = @transform_7, window_bounds = array<i64: 5, 84, 160>}, {pipeline_mode = #tpu.pipeline_mode<synchronous>, transform_indices = @transform_8, window_bounds = array<i64: 5, 10>}, {pipeline_mode = #tpu.pipeline_mode<synchronous>, transform_indices = @transform_9, window_bounds = array<i64: 5, 10>}, {pipeline_mode = #tpu.pipeline_mode<synchronous>, transform_indices = @transform_10, window_bounds = array<i64: 160, 80>}, {pipeline_mode = #tpu.pipeline_mode<synchronous>, transform_indices = @transform_11, window_bounds = array<i64: 160, 80>}, {pipeline_mode = #tpu.pipeline_mode<synchronous>, transform_indices = @transform_12, window_bounds = array<i64: 1, 80>}, {pipeline_mode = #tpu.pipeline_mode<synchronous>, transform_indices = @transform_13, window_bounds = array<i64: 5, 80, 120>}, {pipeline_mode = #tpu.pipeline_mode<synchronous>, transform_indices = @transform_14, window_bounds = array<i64: 1, 120>}, {pipeline_mode = #tpu.pipeline_mode<synchronous>, transform_indices = @transform_15, window_bounds = array<i64: 120, 84>}, {pipeline_mode = #tpu.pipeline_mode<synchronous>, transform_indices = @transform_16, window_bounds = array<i64: 1, 84>}, {pipeline_mode = #tpu.pipeline_mode<synchronous>, transform_indices = @transform_17, window_bounds = array<i64: 84, 10>}, {pipeline_mode = #tpu.pipeline_mode<synchronous>, transform_indices = @transform_18, window_bounds = array<i64: 1, 10>}, {transform_indices = @transform_19, window_bounds = array<i64: 1, 1, 10>}]} {
    %c0 = arith.constant 0 : index
    %c0_0 = arith.constant 0 : index
    %c0_1 = arith.constant 0 : index
    %0 = vector.load %arg1[%c0, %c0_0, %c0_1] : memref<1x32x96xf32, #tpu.memory_space<vmem>>, vector<1x28x96xf32>
    %1 = vector.shape_cast %0 : vector<1x28x96xf32> to vector<28x96xf32>
    %c0_2 = arith.constant 0 : index
    %c0_3 = arith.constant 0 : index
    %c0_4 = arith.constant 0 : index
    %2 = vector.load %arg2[%c0_2, %c0_3, %c0_4] : memref<5x96x168xf32, #tpu.memory_space<vmem>>, vector<1x96x168xf32>
    %3 = vector.shape_cast %2 : vector<1x96x168xf32> to vector<96x168xf32>
    %cst = arith.constant dense<0.000000e+00> : vector<28x168xf32>
    %4 = tpu.matmul %1, %3, %cst {dimension_numbers = #tpu.dot_dimension_numbers<[1], [0], [0], [1], [0, 0, 1, 1], [], []>} : vector<28x96xf32>, vector<96x168xf32>, vector<28x168xf32> -> vector<28x168xf32>
    %c0_5 = arith.constant 0 : index
    %c1 = arith.constant 1 : index
    %c0_6 = arith.constant 0 : index
    %5 = vector.load %arg1[%c0_5, %c1, %c0_6] : memref<1x32x96xf32, #tpu.memory_space<vmem>>, vector<1x28x96xf32>
    %6 = vector.shape_cast %5 : vector<1x28x96xf32> to vector<28x96xf32>
    %c1_7 = arith.constant 1 : index
    %c0_8 = arith.constant 0 : index
    %c0_9 = arith.constant 0 : index
    %7 = vector.load %arg2[%c1_7, %c0_8, %c0_9] : memref<5x96x168xf32, #tpu.memory_space<vmem>>, vector<1x96x168xf32>
    %8 = vector.shape_cast %7 : vector<1x96x168xf32> to vector<96x168xf32>
    %cst_10 = arith.constant dense<0.000000e+00> : vector<28x168xf32>
    %9 = tpu.matmul %6, %8, %cst_10 {dimension_numbers = #tpu.dot_dimension_numbers<[1], [0], [0], [1], [0, 0, 1, 1], [], []>} : vector<28x96xf32>, vector<96x168xf32>, vector<28x168xf32> -> vector<28x168xf32>
    %10 = arith.addf %4, %9 : vector<28x168xf32>
    %c0_11 = arith.constant 0 : index
    %c2 = arith.constant 2 : index
    %c0_12 = arith.constant 0 : index
    %11 = vector.load %arg1[%c0_11, %c2, %c0_12] : memref<1x32x96xf32, #tpu.memory_space<vmem>>, vector<1x28x96xf32>
    %12 = vector.shape_cast %11 : vector<1x28x96xf32> to vector<28x96xf32>
    %c2_13 = arith.constant 2 : index
    %c0_14 = arith.constant 0 : index
    %c0_15 = arith.constant 0 : index
    %13 = vector.load %arg2[%c2_13, %c0_14, %c0_15] : memref<5x96x168xf32, #tpu.memory_space<vmem>>, vector<1x96x168xf32>
    %14 = vector.shape_cast %13 : vector<1x96x168xf32> to vector<96x168xf32>
    %cst_16 = arith.constant dense<0.000000e+00> : vector<28x168xf32>
    %15 = tpu.matmul %12, %14, %cst_16 {dimension_numbers = #tpu.dot_dimension_numbers<[1], [0], [0], [1], [0, 0, 1, 1], [], []>} : vector<28x96xf32>, vector<96x168xf32>, vector<28x168xf32> -> vector<28x168xf32>
    %16 = arith.addf %10, %15 : vector<28x168xf32>
    %c0_17 = arith.constant 0 : index
    %c3 = arith.constant 3 : index
    %c0_18 = arith.constant 0 : index
    %17 = vector.load %arg1[%c0_17, %c3, %c0_18] : memref<1x32x96xf32, #tpu.memory_space<vmem>>, vector<1x28x96xf32>
    %18 = vector.shape_cast %17 : vector<1x28x96xf32> to vector<28x96xf32>
    %c3_19 = arith.constant 3 : index
    %c0_20 = arith.constant 0 : index
    %c0_21 = arith.constant 0 : index
    %19 = vector.load %arg2[%c3_19, %c0_20, %c0_21] : memref<5x96x168xf32, #tpu.memory_space<vmem>>, vector<1x96x168xf32>
    %20 = vector.shape_cast %19 : vector<1x96x168xf32> to vector<96x168xf32>
    %cst_22 = arith.constant dense<0.000000e+00> : vector<28x168xf32>
    %21 = tpu.matmul %18, %20, %cst_22 {dimension_numbers = #tpu.dot_dimension_numbers<[1], [0], [0], [1], [0, 0, 1, 1], [], []>} : vector<28x96xf32>, vector<96x168xf32>, vector<28x168xf32> -> vector<28x168xf32>
    %22 = arith.addf %16, %21 : vector<28x168xf32>
    %c0_23 = arith.constant 0 : index
    %c4 = arith.constant 4 : index
    %c0_24 = arith.constant 0 : index
    %23 = vector.load %arg1[%c0_23, %c4, %c0_24] : memref<1x32x96xf32, #tpu.memory_space<vmem>>, vector<1x28x96xf32>
    %24 = vector.shape_cast %23 : vector<1x28x96xf32> to vector<28x96xf32>
    %c4_25 = arith.constant 4 : index
    %c0_26 = arith.constant 0 : index
    %c0_27 = arith.constant 0 : index
    %25 = vector.load %arg2[%c4_25, %c0_26, %c0_27] : memref<5x96x168xf32, #tpu.memory_space<vmem>>, vector<1x96x168xf32>
    %26 = vector.shape_cast %25 : vector<1x96x168xf32> to vector<96x168xf32>
    %cst_28 = arith.constant dense<0.000000e+00> : vector<28x168xf32>
    %27 = tpu.matmul %24, %26, %cst_28 {dimension_numbers = #tpu.dot_dimension_numbers<[1], [0], [0], [1], [0, 0, 1, 1], [], []>} : vector<28x96xf32>, vector<96x168xf32>, vector<28x168xf32> -> vector<28x168xf32>
    %28 = arith.addf %22, %27 : vector<28x168xf32>
    %c0_29 = arith.constant 0 : index
    %c0_30 = arith.constant 0 : index
    %29 = vector.load %arg3[%c0_29, %c0_30] : memref<14x28xf32, #tpu.memory_space<vmem>>, vector<14x28xf32>
    %cst_31 = arith.constant dense<0.000000e+00> : vector<14x168xf32>
    %30 = tpu.matmul %29, %28, %cst_31 {dimension_numbers = #tpu.dot_dimension_numbers<[1], [0], [0], [1], [0, 0, 1, 1], [], []>} : vector<14x28xf32>, vector<28x168xf32>, vector<14x168xf32> -> vector<14x168xf32>
    %c0_32 = arith.constant 0 : index
    %c0_33 = arith.constant 0 : index
    %31 = vector.load %arg4[%c0_32, %c0_33] : memref<14x28xf32, #tpu.memory_space<vmem>>, vector<14x28xf32>
    %cst_34 = arith.constant dense<0.000000e+00> : vector<14x168xf32>
    %32 = tpu.matmul %31, %28, %cst_34 {dimension_numbers = #tpu.dot_dimension_numbers<[1], [0], [0], [1], [0, 0, 1, 1], [], []>} : vector<14x28xf32>, vector<28x168xf32>, vector<14x168xf32> -> vector<14x168xf32>
    %33 = arith.maximumf %30, %32 : vector<14x168xf32>
    %c0_35 = arith.constant 0 : index
    %c0_36 = arith.constant 0 : index
    %34 = vector.load %arg5[%c0_35, %c0_36] : memref<168x84xf32, #tpu.memory_space<vmem>>, vector<168x84xf32>
    %cst_37 = arith.constant dense<0.000000e+00> : vector<14x84xf32>
    %35 = tpu.matmul %33, %34, %cst_37 {dimension_numbers = #tpu.dot_dimension_numbers<[1], [0], [0], [1], [0, 0, 1, 1], [], []>} : vector<14x168xf32>, vector<168x84xf32>, vector<14x84xf32> -> vector<14x84xf32>
    %c0_38 = arith.constant 0 : index
    %c0_39 = arith.constant 0 : index
    %36 = vector.load %arg6[%c0_38, %c0_39] : memref<168x84xf32, #tpu.memory_space<vmem>>, vector<168x84xf32>
    %cst_40 = arith.constant dense<0.000000e+00> : vector<14x84xf32>
    %37 = tpu.matmul %33, %36, %cst_40 {dimension_numbers = #tpu.dot_dimension_numbers<[1], [0], [0], [1], [0, 0, 1, 1], [], []>} : vector<14x168xf32>, vector<168x84xf32>, vector<14x84xf32> -> vector<14x84xf32>
    %38 = arith.maximumf %35, %37 : vector<14x84xf32>
    %c0_41 = arith.constant 0 : index
    %c0_42 = arith.constant 0 : index
    %39 = vector.load %arg7[%c0_41, %c0_42] : memref<1x84xf32, #tpu.memory_space<vmem>>, vector<1x84xf32>
    %40 = vector.broadcast %39 : vector<1x84xf32> to vector<14x84xf32>
    %41 = arith.addf %38, %40 : vector<14x84xf32>
    %cst_43 = arith.constant 0.000000e+00 : f32
    %42 = vector.broadcast %cst_43 : f32 to vector<14x84xf32>
    %43 = arith.maximumf %41, %42 : vector<14x84xf32>
    %44 = vector.extract_strided_slice %43 {offsets = [0, 0], sizes = [10, 84], strides = [1, 1]} : vector<14x84xf32> to vector<10x84xf32>
    %c0_44 = arith.constant 0 : index
    %c0_45 = arith.constant 0 : index
    %c0_46 = arith.constant 0 : index
    %45 = vector.load %arg8[%c0_44, %c0_45, %c0_46] : memref<5x84x160xf32, #tpu.memory_space<vmem>>, vector<1x84x160xf32>
    %46 = vector.shape_cast %45 : vector<1x84x160xf32> to vector<84x160xf32>
    %cst_47 = arith.constant dense<0.000000e+00> : vector<10x160xf32>
    %47 = tpu.matmul %44, %46, %cst_47 {dimension_numbers = #tpu.dot_dimension_numbers<[1], [0], [0], [1], [0, 0, 1, 1], [], []>} : vector<10x84xf32>, vector<84x160xf32>, vector<10x160xf32> -> vector<10x160xf32>
    %48 = vector.extract_strided_slice %43 {offsets = [1, 0], sizes = [10, 84], strides = [1, 1]} : vector<14x84xf32> to vector<10x84xf32>
    %c1_48 = arith.constant 1 : index
    %c0_49 = arith.constant 0 : index
    %c0_50 = arith.constant 0 : index
    %49 = vector.load %arg8[%c1_48, %c0_49, %c0_50] : memref<5x84x160xf32, #tpu.memory_space<vmem>>, vector<1x84x160xf32>
    %50 = vector.shape_cast %49 : vector<1x84x160xf32> to vector<84x160xf32>
    %cst_51 = arith.constant dense<0.000000e+00> : vector<10x160xf32>
    %51 = tpu.matmul %48, %50, %cst_51 {dimension_numbers = #tpu.dot_dimension_numbers<[1], [0], [0], [1], [0, 0, 1, 1], [], []>} : vector<10x84xf32>, vector<84x160xf32>, vector<10x160xf32> -> vector<10x160xf32>
    %52 = arith.addf %47, %51 : vector<10x160xf32>
    %53 = vector.extract_strided_slice %43 {offsets = [2, 0], sizes = [10, 84], strides = [1, 1]} : vector<14x84xf32> to vector<10x84xf32>
    %c2_52 = arith.constant 2 : index
    %c0_53 = arith.constant 0 : index
    %c0_54 = arith.constant 0 : index
    %54 = vector.load %arg8[%c2_52, %c0_53, %c0_54] : memref<5x84x160xf32, #tpu.memory_space<vmem>>, vector<1x84x160xf32>
    %55 = vector.shape_cast %54 : vector<1x84x160xf32> to vector<84x160xf32>
    %cst_55 = arith.constant dense<0.000000e+00> : vector<10x160xf32>
    %56 = tpu.matmul %53, %55, %cst_55 {dimension_numbers = #tpu.dot_dimension_numbers<[1], [0], [0], [1], [0, 0, 1, 1], [], []>} : vector<10x84xf32>, vector<84x160xf32>, vector<10x160xf32> -> vector<10x160xf32>
    %57 = arith.addf %52, %56 : vector<10x160xf32>
    %58 = vector.extract_strided_slice %43 {offsets = [3, 0], sizes = [10, 84], strides = [1, 1]} : vector<14x84xf32> to vector<10x84xf32>
    %c3_56 = arith.constant 3 : index
    %c0_57 = arith.constant 0 : index
    %c0_58 = arith.constant 0 : index
    %59 = vector.load %arg8[%c3_56, %c0_57, %c0_58] : memref<5x84x160xf32, #tpu.memory_space<vmem>>, vector<1x84x160xf32>
    %60 = vector.shape_cast %59 : vector<1x84x160xf32> to vector<84x160xf32>
    %cst_59 = arith.constant dense<0.000000e+00> : vector<10x160xf32>
    %61 = tpu.matmul %58, %60, %cst_59 {dimension_numbers = #tpu.dot_dimension_numbers<[1], [0], [0], [1], [0, 0, 1, 1], [], []>} : vector<10x84xf32>, vector<84x160xf32>, vector<10x160xf32> -> vector<10x160xf32>
    %62 = arith.addf %57, %61 : vector<10x160xf32>
    %63 = vector.extract_strided_slice %43 {offsets = [4, 0], sizes = [10, 84], strides = [1, 1]} : vector<14x84xf32> to vector<10x84xf32>
    %c4_60 = arith.constant 4 : index
    %c0_61 = arith.constant 0 : index
    %c0_62 = arith.constant 0 : index
    %64 = vector.load %arg8[%c4_60, %c0_61, %c0_62] : memref<5x84x160xf32, #tpu.memory_space<vmem>>, vector<1x84x160xf32>
    %65 = vector.shape_cast %64 : vector<1x84x160xf32> to vector<84x160xf32>
    %cst_63 = arith.constant dense<0.000000e+00> : vector<10x160xf32>
    %66 = tpu.matmul %63, %65, %cst_63 {dimension_numbers = #tpu.dot_dimension_numbers<[1], [0], [0], [1], [0, 0, 1, 1], [], []>} : vector<10x84xf32>, vector<84x160xf32>, vector<10x160xf32> -> vector<10x160xf32>
    %67 = arith.addf %62, %66 : vector<10x160xf32>
    %c0_64 = arith.constant 0 : index
    %c0_65 = arith.constant 0 : index
    %68 = vector.load %arg9[%c0_64, %c0_65] : memref<5x10xf32, #tpu.memory_space<vmem>>, vector<5x10xf32>
    %cst_66 = arith.constant dense<0.000000e+00> : vector<5x160xf32>
    %69 = tpu.matmul %68, %67, %cst_66 {dimension_numbers = #tpu.dot_dimension_numbers<[1], [0], [0], [1], [0, 0, 1, 1], [], []>} : vector<5x10xf32>, vector<10x160xf32>, vector<5x160xf32> -> vector<5x160xf32>
    %c0_67 = arith.constant 0 : index
    %c0_68 = arith.constant 0 : index
    %70 = vector.load %arg10[%c0_67, %c0_68] : memref<5x10xf32, #tpu.memory_space<vmem>>, vector<5x10xf32>
    %cst_69 = arith.constant dense<0.000000e+00> : vector<5x160xf32>
    %71 = tpu.matmul %70, %67, %cst_69 {dimension_numbers = #tpu.dot_dimension_numbers<[1], [0], [0], [1], [0, 0, 1, 1], [], []>} : vector<5x10xf32>, vector<10x160xf32>, vector<5x160xf32> -> vector<5x160xf32>
    %72 = arith.maximumf %69, %71 : vector<5x160xf32>
    %c0_70 = arith.constant 0 : index
    %c0_71 = arith.constant 0 : index
    %73 = vector.load %arg11[%c0_70, %c0_71] : memref<160x80xf32, #tpu.memory_space<vmem>>, vector<160x80xf32>
    %cst_72 = arith.constant dense<0.000000e+00> : vector<5x80xf32>
    %74 = tpu.matmul %72, %73, %cst_72 {dimension_numbers = #tpu.dot_dimension_numbers<[1], [0], [0], [1], [0, 0, 1, 1], [], []>} : vector<5x160xf32>, vector<160x80xf32>, vector<5x80xf32> -> vector<5x80xf32>
    %c0_73 = arith.constant 0 : index
    %c0_74 = arith.constant 0 : index
    %75 = vector.load %arg12[%c0_73, %c0_74] : memref<160x80xf32, #tpu.memory_space<vmem>>, vector<160x80xf32>
    %cst_75 = arith.constant dense<0.000000e+00> : vector<5x80xf32>
    %76 = tpu.matmul %72, %75, %cst_75 {dimension_numbers = #tpu.dot_dimension_numbers<[1], [0], [0], [1], [0, 0, 1, 1], [], []>} : vector<5x160xf32>, vector<160x80xf32>, vector<5x80xf32> -> vector<5x80xf32>
    %77 = arith.maximumf %74, %76 : vector<5x80xf32>
    %c0_76 = arith.constant 0 : index
    %c0_77 = arith.constant 0 : index
    %78 = vector.load %arg13[%c0_76, %c0_77] : memref<1x80xf32, #tpu.memory_space<vmem>>, vector<1x80xf32>
    %79 = vector.broadcast %78 : vector<1x80xf32> to vector<5x80xf32>
    %80 = arith.addf %77, %79 : vector<5x80xf32>
    %cst_78 = arith.constant 0.000000e+00 : f32
    %81 = vector.broadcast %cst_78 : f32 to vector<5x80xf32>
    %82 = arith.maximumf %80, %81 : vector<5x80xf32>
    %83 = vector.extract_strided_slice %82 {offsets = [0, 0], sizes = [1, 80], strides = [1, 1]} : vector<5x80xf32> to vector<1x80xf32>
    %c0_79 = arith.constant 0 : index
    %c0_80 = arith.constant 0 : index
    %c0_81 = arith.constant 0 : index
    %84 = vector.load %arg14[%c0_79, %c0_80, %c0_81] : memref<5x80x120xf32, #tpu.memory_space<vmem>>, vector<1x80x120xf32>
    %85 = vector.shape_cast %84 : vector<1x80x120xf32> to vector<80x120xf32>
    %cst_82 = arith.constant dense<0.000000e+00> : vector<1x120xf32>
    %86 = tpu.matmul %83, %85, %cst_82 {dimension_numbers = #tpu.dot_dimension_numbers<[1], [0], [0], [1], [0, 0, 1, 1], [], []>} : vector<1x80xf32>, vector<80x120xf32>, vector<1x120xf32> -> vector<1x120xf32>
    %87 = vector.extract_strided_slice %82 {offsets = [1, 0], sizes = [1, 80], strides = [1, 1]} : vector<5x80xf32> to vector<1x80xf32>
    %c1_83 = arith.constant 1 : index
    %c0_84 = arith.constant 0 : index
    %c0_85 = arith.constant 0 : index
    %88 = vector.load %arg14[%c1_83, %c0_84, %c0_85] : memref<5x80x120xf32, #tpu.memory_space<vmem>>, vector<1x80x120xf32>
    %89 = vector.shape_cast %88 : vector<1x80x120xf32> to vector<80x120xf32>
    %cst_86 = arith.constant dense<0.000000e+00> : vector<1x120xf32>
    %90 = tpu.matmul %87, %89, %cst_86 {dimension_numbers = #tpu.dot_dimension_numbers<[1], [0], [0], [1], [0, 0, 1, 1], [], []>} : vector<1x80xf32>, vector<80x120xf32>, vector<1x120xf32> -> vector<1x120xf32>
    %91 = arith.addf %86, %90 : vector<1x120xf32>
    %92 = vector.extract_strided_slice %82 {offsets = [2, 0], sizes = [1, 80], strides = [1, 1]} : vector<5x80xf32> to vector<1x80xf32>
    %c2_87 = arith.constant 2 : index
    %c0_88 = arith.constant 0 : index
    %c0_89 = arith.constant 0 : index
    %93 = vector.load %arg14[%c2_87, %c0_88, %c0_89] : memref<5x80x120xf32, #tpu.memory_space<vmem>>, vector<1x80x120xf32>
    %94 = vector.shape_cast %93 : vector<1x80x120xf32> to vector<80x120xf32>
    %cst_90 = arith.constant dense<0.000000e+00> : vector<1x120xf32>
    %95 = tpu.matmul %92, %94, %cst_90 {dimension_numbers = #tpu.dot_dimension_numbers<[1], [0], [0], [1], [0, 0, 1, 1], [], []>} : vector<1x80xf32>, vector<80x120xf32>, vector<1x120xf32> -> vector<1x120xf32>
    %96 = arith.addf %91, %95 : vector<1x120xf32>
    %97 = vector.extract_strided_slice %82 {offsets = [3, 0], sizes = [1, 80], strides = [1, 1]} : vector<5x80xf32> to vector<1x80xf32>
    %c3_91 = arith.constant 3 : index
    %c0_92 = arith.constant 0 : index
    %c0_93 = arith.constant 0 : index
    %98 = vector.load %arg14[%c3_91, %c0_92, %c0_93] : memref<5x80x120xf32, #tpu.memory_space<vmem>>, vector<1x80x120xf32>
    %99 = vector.shape_cast %98 : vector<1x80x120xf32> to vector<80x120xf32>
    %cst_94 = arith.constant dense<0.000000e+00> : vector<1x120xf32>
    %100 = tpu.matmul %97, %99, %cst_94 {dimension_numbers = #tpu.dot_dimension_numbers<[1], [0], [0], [1], [0, 0, 1, 1], [], []>} : vector<1x80xf32>, vector<80x120xf32>, vector<1x120xf32> -> vector<1x120xf32>
    %101 = arith.addf %96, %100 : vector<1x120xf32>
    %102 = vector.extract_strided_slice %82 {offsets = [4, 0], sizes = [1, 80], strides = [1, 1]} : vector<5x80xf32> to vector<1x80xf32>
    %c4_95 = arith.constant 4 : index
    %c0_96 = arith.constant 0 : index
    %c0_97 = arith.constant 0 : index
    %103 = vector.load %arg14[%c4_95, %c0_96, %c0_97] : memref<5x80x120xf32, #tpu.memory_space<vmem>>, vector<1x80x120xf32>
    %104 = vector.shape_cast %103 : vector<1x80x120xf32> to vector<80x120xf32>
    %cst_98 = arith.constant dense<0.000000e+00> : vector<1x120xf32>
    %105 = tpu.matmul %102, %104, %cst_98 {dimension_numbers = #tpu.dot_dimension_numbers<[1], [0], [0], [1], [0, 0, 1, 1], [], []>} : vector<1x80xf32>, vector<80x120xf32>, vector<1x120xf32> -> vector<1x120xf32>
    %106 = arith.addf %101, %105 : vector<1x120xf32>
    %c0_99 = arith.constant 0 : index
    %c0_100 = arith.constant 0 : index
    %107 = vector.load %arg15[%c0_99, %c0_100] : memref<1x120xf32, #tpu.memory_space<vmem>>, vector<1x120xf32>
    %108 = arith.addf %106, %107 : vector<1x120xf32>
    %cst_101 = arith.constant 0.000000e+00 : f32
    %109 = vector.broadcast %cst_101 : f32 to vector<1x120xf32>
    %110 = arith.maximumf %108, %109 : vector<1x120xf32>
    %c0_102 = arith.constant 0 : index
    %c0_103 = arith.constant 0 : index
    %111 = vector.load %arg16[%c0_102, %c0_103] : memref<120x84xf32, #tpu.memory_space<vmem>>, vector<120x84xf32>
    %cst_104 = arith.constant dense<0.000000e+00> : vector<1x84xf32>
    %112 = tpu.matmul %110, %111, %cst_104 {dimension_numbers = #tpu.dot_dimension_numbers<[1], [0], [0], [1], [0, 0, 1, 1], [], []>} : vector<1x120xf32>, vector<120x84xf32>, vector<1x84xf32> -> vector<1x84xf32>
    %c0_105 = arith.constant 0 : index
    %c0_106 = arith.constant 0 : index
    %113 = vector.load %arg17[%c0_105, %c0_106] : memref<1x84xf32, #tpu.memory_space<vmem>>, vector<1x84xf32>
    %114 = arith.addf %112, %113 : vector<1x84xf32>
    %cst_107 = arith.constant 0.000000e+00 : f32
    %115 = vector.broadcast %cst_107 : f32 to vector<1x84xf32>
    %116 = arith.maximumf %114, %115 : vector<1x84xf32>
    %c0_108 = arith.constant 0 : index
    %c0_109 = arith.constant 0 : index
    %117 = vector.load %arg18[%c0_108, %c0_109] : memref<84x10xf32, #tpu.memory_space<vmem>>, vector<84x10xf32>
    %cst_110 = arith.constant dense<0.000000e+00> : vector<1x10xf32>
    %118 = tpu.matmul %116, %117, %cst_110 {dimension_numbers = #tpu.dot_dimension_numbers<[1], [0], [0], [1], [0, 0, 1, 1], [], []>} : vector<1x84xf32>, vector<84x10xf32>, vector<1x10xf32> -> vector<1x10xf32>
    %c0_111 = arith.constant 0 : index
    %c0_112 = arith.constant 0 : index
    %119 = vector.load %arg19[%c0_111, %c0_112] : memref<1x10xf32, #tpu.memory_space<vmem>>, vector<1x10xf32>
    %120 = arith.addf %118, %119 : vector<1x10xf32>
    %c0_113 = arith.constant 0 : index
    %c0_114 = arith.constant 0 : index
    %c0_115 = arith.constant 0 : index
    %121 = vector.load %arg20[%c0_113, %c0_114, %c0_115] : memref<1x1x10xf32, #tpu.memory_space<vmem>>, vector<1x1x10xf32>
    %122 = vector.shape_cast %121 : vector<1x1x10xf32> to vector<1x10xf32>
    %123 = vector.shape_cast %120 : vector<1x10xf32> to vector<1x1x10xf32>
    tpu.vector_store %arg20[%c0_113, %c0_114, %c0_115], %123 {strides = array<i32>} : memref<1x1x10xf32, #tpu.memory_space<vmem>>, vector<1x1x10xf32>,
    return
  }
  func.func @transform_0(%arg0: i32) -> (i32, i32, i32) {
    %c0_i32 = arith.constant 0 : i32
    %c0_i32_0 = arith.constant 0 : i32
    %c0_i32_1 = arith.constant 0 : i32
    return %arg0, %c0_i32, %c0_i32_0 : i32, i32, i32
  }
  func.func @transform_1(%arg0: i32) -> (i32, i32, i32) {
    %c0_i32 = arith.constant 0 : i32
    %c0_i32_0 = arith.constant 0 : i32
    %c0_i32_1 = arith.constant 0 : i32
    %c0_i32_2 = arith.constant 0 : i32
    return %c0_i32, %c0_i32_0, %c0_i32_1 : i32, i32, i32
  }
  func.func @transform_2(%arg0: i32) -> (i32, i32) {
    %c0_i32 = arith.constant 0 : i32
    %c0_i32_0 = arith.constant 0 : i32
    %c0_i32_1 = arith.constant 0 : i32
    return %c0_i32, %c0_i32_0 : i32, i32
  }
  func.func @transform_3(%arg0: i32) -> (i32, i32) {
    %c0_i32 = arith.constant 0 : i32
    %c0_i32_0 = arith.constant 0 : i32
    %c0_i32_1 = arith.constant 0 : i32
    return %c0_i32, %c0_i32_0 : i32, i32
  }
  func.func @transform_4(%arg0: i32) -> (i32, i32) {
    %c0_i32 = arith.constant 0 : i32
    %c0_i32_0 = arith.constant 0 : i32
    %c0_i32_1 = arith.constant 0 : i32
    return %c0_i32, %c0_i32_0 : i32, i32
  }
  func.func @transform_5(%arg0: i32) -> (i32, i32) {
    %c0_i32 = arith.constant 0 : i32
    %c0_i32_0 = arith.constant 0 : i32
    %c0_i32_1 = arith.constant 0 : i32
    return %c0_i32, %c0_i32_0 : i32, i32
  }
  func.func @transform_6(%arg0: i32) -> (i32, i32) {
    %c0_i32 = arith.constant 0 : i32
    %c0_i32_0 = arith.constant 0 : i32
    %c0_i32_1 = arith.constant 0 : i32
    return %c0_i32, %c0_i32_0 : i32, i32
  }
  func.func @transform_7(%arg0: i32) -> (i32, i32, i32) {
    %c0_i32 = arith.constant 0 : i32
    %c0_i32_0 = arith.constant 0 : i32
    %c0_i32_1 = arith.constant 0 : i32
    %c0_i32_2 = arith.constant 0 : i32
    return %c0_i32, %c0_i32_0, %c0_i32_1 : i32, i32, i32
  }
  func.func @transform_8(%arg0: i32) -> (i32, i32) {
    %c0_i32 = arith.constant 0 : i32
    %c0_i32_0 = arith.constant 0 : i32
    %c0_i32_1 = arith.constant 0 : i32
    return %c0_i32, %c0_i32_0 : i32, i32
  }
  func.func @transform_9(%arg0: i32) -> (i32, i32) {
    %c0_i32 = arith.constant 0 : i32
    %c0_i32_0 = arith.constant 0 : i32
    %c0_i32_1 = arith.constant 0 : i32
    return %c0_i32, %c0_i32_0 : i32, i32
  }
  func.func @transform_10(%arg0: i32) -> (i32, i32) {
    %c0_i32 = arith.constant 0 : i32
    %c0_i32_0 = arith.constant 0 : i32
    %c0_i32_1 = arith.constant 0 : i32
    return %c0_i32, %c0_i32_0 : i32, i32
  }
  func.func @transform_11(%arg0: i32) -> (i32, i32) {
    %c0_i32 = arith.constant 0 : i32
    %c0_i32_0 = arith.constant 0 : i32
    %c0_i32_1 = arith.constant 0 : i32
    return %c0_i32, %c0_i32_0 : i32, i32
  }
  func.func @transform_12(%arg0: i32) -> (i32, i32) {
    %c0_i32 = arith.constant 0 : i32
    %c0_i32_0 = arith.constant 0 : i32
    %c0_i32_1 = arith.constant 0 : i32
    return %c0_i32, %c0_i32_0 : i32, i32
  }
  func.func @transform_13(%arg0: i32) -> (i32, i32, i32) {
    %c0_i32 = arith.constant 0 : i32
    %c0_i32_0 = arith.constant 0 : i32
    %c0_i32_1 = arith.constant 0 : i32
    %c0_i32_2 = arith.constant 0 : i32
    return %c0_i32, %c0_i32_0, %c0_i32_1 : i32, i32, i32
  }
  func.func @transform_14(%arg0: i32) -> (i32, i32) {
    %c0_i32 = arith.constant 0 : i32
    %c0_i32_0 = arith.constant 0 : i32
    %c0_i32_1 = arith.constant 0 : i32
    return %c0_i32, %c0_i32_0 : i32, i32
  }
  func.func @transform_15(%arg0: i32) -> (i32, i32) {
    %c0_i32 = arith.constant 0 : i32
    %c0_i32_0 = arith.constant 0 : i32
    %c0_i32_1 = arith.constant 0 : i32
    return %c0_i32, %c0_i32_0 : i32, i32
  }
  func.func @transform_16(%arg0: i32) -> (i32, i32) {
    %c0_i32 = arith.constant 0 : i32
    %c0_i32_0 = arith.constant 0 : i32
    %c0_i32_1 = arith.constant 0 : i32
    return %c0_i32, %c0_i32_0 : i32, i32
  }
  func.func @transform_17(%arg0: i32) -> (i32, i32) {
    %c0_i32 = arith.constant 0 : i32
    %c0_i32_0 = arith.constant 0 : i32
    %c0_i32_1 = arith.constant 0 : i32
    return %c0_i32, %c0_i32_0 : i32, i32
  }
  func.func @transform_18(%arg0: i32) -> (i32, i32) {
    %c0_i32 = arith.constant 0 : i32
    %c0_i32_0 = arith.constant 0 : i32
    %c0_i32_1 = arith.constant 0 : i32
    return %c0_i32, %c0_i32_0 : i32, i32
  }
  func.func @transform_19(%arg0: i32) -> (i32, i32, i32) {
    %c0_i32 = arith.constant 0 : i32
    %c0_i32_0 = arith.constant 0 : i32
    %c0_i32_1 = arith.constant 0 : i32
    return %arg0, %c0_i32, %c0_i32_0 : i32, i32, i32
  }
}

</mosaic_0001>

<bundles_post_ra>
// kernel: tile.13
= control target key start
LH: loop header
LB: loop body
LE: loop exit
PB: predicated region body
PF: predicated region fallthrough
CT: control target
= control target key end

     0   :  { %s28_s0 = inlined_call_operand.vmem [shape: f32[6], index: 0, kind: input, shape index: {}]   ;;  %s29_s1 = inlined_call_operand.vmem [shape: f32[14,6], index: 1, kind: output, shape index: {}]  }
   0x1   :  { %v4_v0 = vld [vmem:[%s28_s0] ss:$0 sm:$0xff] }
   0x2   :  { %5 = vst [vmem:[%s29_s1] sm:$0xff] %v4_v0  ;;  %8 = vst [vmem:[%s29_s1 + $0x8] sm:$0xff] %v4_v0 }

// kernel: tile.14
= control target key start
LH: loop header
LB: loop body
LE: loop exit
PB: predicated region body
PF: predicated region fallthrough
CT: control target
= control target key end

     0   :  { %s115_s10 = smov 78   ;;  %s116_s11 = smov 66   ;;  %vm3_vm0 = vcmask 48128   ;;  %vm9_vm1 = vcmask 687728   ;;  %vm15_vm2 = vcmask 638528   ;;  %vm21_vm3 = vcmask 589328   ;;  %s183_s0 = inlined_call_operand.vmem [shape: f32[14,6], index: 0, kind: input, shape index: {}]   ;;  %s184_s1 = inlined_call_operand.vmem [shape: f32[1,84], index: 1, kind: output, shape index: {}]  }
   0x1   :  { %v89_v0 = vld [vmem:[%s183_s0 + $0xd] sm:$0x1]   ;;  %v91_v1 = vld [vmem:[%s183_s0 + $0xb] sm:$0x1]   ;;  %v90_v2 = vld [vmem:[%s183_s0 + $0xc] sm:$0x1]  }
   0x2   :  { %7 = vrot.lane.b32.xlu0 %v89_v0, %s115_s10  ;;  %19 = vrot.lane.b32.xlu1 %v91_v1, %s116_s11  ;;  %v92_v3 = vld [vmem:[%s183_s0 + $0xa] sm:$0x1]   ;;  %s117_s16 = smov 72   ;;  %s118_s17 = smov 60   ;;  %v93_v4 = vld [vmem:[%s183_s0 + $0x9] sm:$0x1]  }
   0x3   :  { %v94_v5 = vld [vmem:[%s183_s0 + $0x8] sm:$0x1]   ;;  %v2_v6 = vld [vmem:[%s183_s0] sm:$0x1]   ;;  %s119_s24 = smov 54   ;;  %s120_s25 = smov 48  }
   0x4   :  { %4 = vst.msk [vmem:[#allocation0] sm:$0x1] %vm3_vm0, %v2_v6   ;;  %v95_v7 = vld [vmem:[%s183_s0 + $0x7] sm:$0x1]   ;;  %v96_v8 = vld [vmem:[%s183_s0 + $0x6] sm:$0x1]  }
   0x5   :  { %s121_s30 = smov 42   ;;  %s122_s2 = smov 36   ;;  %v97_v9 = vld [vmem:[%s183_s0 + $0x5] sm:$0x1]   ;;  %v98_v10 = vld [vmem:[%s183_s0 + $0x4] sm:$0x1]  }
   0x6   :  { %13 = vrot.lane.b32.xlu0 %v90_v2, %s117_s16  ;;  %25 = vrot.lane.b32.xlu1 %v92_v3, %s118_s17  ;;  %s123_s7 = smov 30   ;;  %s124_s8 = smov 24   ;;  %v99_v11 = vld [vmem:[%s183_s0 + $0x3] sm:$0x1]   ;;  %v100_v12 = vld [vmem:[%s183_s0 + $0x2] sm:$0x1]  }
   0x7   :  { %s125_s13 = smov 18   ;;  %s126_s14 = smov 12   ;;  %v101_v13 = vld [vmem:[%s183_s0 + $0x1] sm:$0x1]   ;;  %vm27_vm4 = vcmask 540128   ;;  %vm33_vm5 = vcmask 490928  }
   0x8   :  { %s127_s0 = smov 6   ;;  %vm39_vm6 = vcmask 441728   ;;  %vm45_vm7 = vcmask 392528   ;;  %vm51_vm8 = vcmask 343328   ;;  %vm57_vm9 = vcmask 294128  }
   0x9   :  { %vm63_vm10 = vcmask 244928   ;;  %vm69_vm11 = vcmask 195728   ;;  %vm75_vm12 = vcmask 146528   ;;  %vm81_vm13 = vcmask 97328  }
   0xa   :  { %31 = vrot.lane.b32.xlu0 %v93_v4, %s119_s24  ;;  %37 = vrot.lane.b32.xlu1 %v94_v5, %s120_s25 }
   0xe   :  { %43 = vrot.lane.b32.xlu0 %v95_v7, %s121_s30  ;;  %49 = vrot.lane.b32.xlu1 %v96_v8, %s122_s2 }
  0x12   :  { %55 = vrot.lane.b32.xlu0 %v97_v9, %s123_s7  ;;  %61 = vrot.lane.b32.xlu1 %v98_v10, %s124_s8 }
  0x16   :  { %67 = vrot.lane.b32.xlu0 %v99_v11, %s125_s13  ;;  %73 = vrot.lane.b32.xlu1 %v100_v12, %s126_s14 }
  0x1a   :  { %79 = vrot.lane.b32.xlu0 %v101_v13, %s127_s0 }
  0x74   :  { %v8_v14 = vpop.permute.xlu0 %7   ;;  %v20_v15 = vpop.permute.xlu1 %19  }
  0x75   :  { %10 = vst.msk [vmem:[#allocation0] sm:$0x1] %vm9_vm1, %v8_v14  }
  0x78   :  { %v14_v16 = vpop.permute.xlu0 %13   ;;  %v26_v17 = vpop.permute.xlu1 %25  }
  0x79   :  { %16 = vst.msk [vmem:[#allocation0] sm:$0x1] %vm15_vm2, %v14_v16  }
  0x7a   :  { %22 = vst.msk [vmem:[#allocation0] sm:$0x1] %vm21_vm3, %v20_v15  }
  0x7b   :  { %28 = vst.msk [vmem:[#allocation0] sm:$0x1] %vm27_vm4, %v26_v17  }
  0x7c   :  { %v32_v18 = vpop.permute.xlu0 %31   ;;  %v38_v19 = vpop.permute.xlu1 %37  }
  0x7d   :  { %34 = vst.msk [vmem:[#allocation0] sm:$0x1] %vm33_vm5, %v32_v18  }
  0x7e   :  { %40 = vst.msk [vmem:[#allocation0] sm:$0x1] %vm39_vm6, %v38_v19  }
  0x80   :  { %v44_v20 = vpop.permute.xlu0 %43   ;;  %v50_v21 = vpop.permute.xlu1 %49  }
  0x81   :  { %46 = vst.msk [vmem:[#allocation0] sm:$0x1] %vm45_vm7, %v44_v20  }
  0x82   :  { %52 = vst.msk [vmem:[#allocation0] sm:$0x1] %vm51_vm8, %v50_v21  }
  0x84   :  { %v56_v22 = vpop.permute.xlu0 %55   ;;  %v62_v23 = vpop.permute.xlu1 %61  }
  0x85   :  { %58 = vst.msk [vmem:[#allocation0] sm:$0x1] %vm57_vm9, %v56_v22  }
  0x86   :  { %64 = vst.msk [vmem:[#allocation0] sm:$0x1] %vm63_vm10, %v62_v23  }
  0x88   :  { %v68_v24 = vpop.permute.xlu0 %67   ;;  %v74_v25 = vpop.permute.xlu1 %73  }
  0x89   :  { %70 = vst.msk [vmem:[#allocation0] sm:$0x1] %vm69_vm11, %v68_v24  }
  0x8a   :  { %76 = vst.msk [vmem:[#allocation0] sm:$0x1] %vm75_vm12, %v74_v25  }
  0x8c   :  { %v80_v26 = vpop.permute.xlu0 %79  }
  0x8d   :  { %82 = vst.msk [vmem:[#allocation0] sm:$0x1] %vm81_vm13, %v80_v26  }
  0x94   :  { %v86_v27 = vld [vmem:[#allocation0] sm:$0x1] }
  0x95   :  { %88 = vst [vmem:[%s184_s1] sm:$0x1] %v86_v27 }

// kernel: tile.18
= control target key start
LH: loop header
LB: loop body
LE: loop exit
PB: predicated region body
PF: predicated region fallthrough
CT: control target
= control target key end

     0   :  { %s22_s0 = inlined_call_operand.vmem [shape: f32[16], index: 0, kind: input, shape index: {}]   ;;  %s23_s1 = inlined_call_operand.vmem [shape: f32[5,16], index: 1, kind: output, shape index: {}]  }
   0x1   :  { %v4_v0 = vld [vmem:[%s22_s0] ss:$0 sm:$0xff] }
   0x2   :  { %5 = vst [vmem:[%s23_s1] sm:$0xff] %v4_v0 }

// kernel: tile.19
= control target key start
LH: loop header
LB: loop body
LE: loop exit
PB: predicated region body
PF: predicated region fallthrough
CT: control target
= control target key end

     0   :  { %s43_s10 = smov 64   ;;  %s44_s11 = smov 32   ;;  %vm3_vm0 = vcmask 130048   ;;  %vm9_vm1 = vcmask 654848   ;;  %vm15_vm2 = vcmask 523648   ;;  %vm21_vm3 = vcmask 392448   ;;  %s75_s0 = inlined_call_operand.vmem [shape: f32[5,16], index: 0, kind: input, shape index: {}]   ;;  %s76_s1 = inlined_call_operand.vmem [shape: f32[1,80], index: 1, kind: output, shape index: {}]  }
   0x1   :  { %v35_v0 = vld [vmem:[%s75_s0 + $0x4] sm:$0x1]   ;;  %v37_v1 = vld [vmem:[%s75_s0 + $0x2] sm:$0x1]   ;;  %v36_v2 = vld [vmem:[%s75_s0 + $0x3] sm:$0x1]  }
   0x2   :  { %7 = vrot.lane.b32.xlu0 %v35_v0, %s43_s10  ;;  %19 = vrot.lane.b32.xlu1 %v37_v1, %s44_s11  ;;  %v38_v3 = vld [vmem:[%s75_s0 + $0x1] sm:$0x1]   ;;  %v2_v4 = vld [vmem:[%s75_s0] sm:$0x1]   ;;  %s45_s0 = smov 48   ;;  %s46_s18 = smov 16  }
   0x3   :  { %4 = vst.msk [vmem:[#allocation0] sm:$0x1] %vm3_vm0, %v2_v4   ;;  %vm27_vm4 = vcmask 261248  }
   0x6   :  { %13 = vrot.lane.b32.xlu0 %v36_v2, %s45_s0  ;;  %25 = vrot.lane.b32.xlu1 %v38_v3, %s46_s18 }
  0x74   :  { %v8_v5 = vpop.permute.xlu0 %7   ;;  %v20_v6 = vpop.permute.xlu1 %19  }
  0x75   :  { %10 = vst.msk [vmem:[#allocation0] sm:$0x1] %vm9_vm1, %v8_v5  }
  0x78   :  { %v14_v7 = vpop.permute.xlu0 %13   ;;  %v26_v8 = vpop.permute.xlu1 %25  }
  0x79   :  { %16 = vst.msk [vmem:[#allocation0] sm:$0x1] %vm15_vm2, %v14_v7  }
  0x7a   :  { %22 = vst.msk [vmem:[#allocation0] sm:$0x1] %vm21_vm3, %v20_v6  }
  0x7b   :  { %28 = vst.msk [vmem:[#allocation0] sm:$0x1] %vm27_vm4, %v26_v8  }
  0x82   :  { %v32_v9 = vld [vmem:[#allocation0] sm:$0x1] }
  0x83   :  { %34 = vst [vmem:[%s76_s1] sm:$0x1] %v32_v9 }

// kernel: lenet_forward.1
= control target key start
LH: loop header
LB: loop body
LE: loop exit
PB: predicated region body
PF: predicated region fallthrough
CT: control target
= control target key end

     0   :  { %s6133_s0 = inlined_call_operand.vmem [shape: f32[2,32,96], index: 0, kind: input, shape index: {}]   ;;  %s6134_s1 = inlined_call_operand.vmem [shape: f32[5,96,168], index: 1, kind: input, shape index: {}]   ;;  %s6135_s2 = inlined_call_operand.vmem [shape: f32[14,28], index: 2, kind: input, shape index: {}]   ;;  %s6136_s3 = inlined_call_operand.vmem [shape: f32[14,28], index: 3, kind: input, shape index: {}]   ;;  %s6137_s4 = inlined_call_operand.vmem [shape: f32[168,84], index: 4, kind: input, shape index: {}]   ;;  %s6138_s5 = inlined_call_operand.vmem [shape: f32[168,84], index: 5, kind: input, shape index: {}]   ;;  %s6139_s6 = inlined_call_operand.vmem [shape: f32[1,84], index: 6, kind: input, shape index: {}]   ;;  %s6140_s7 = inlined_call_operand.vmem [shape: f32[5,84,160], index: 7, kind: input, shape index: {}]   ;;  %s6141_s8 = inlined_call_operand.vmem [shape: f32[5,10], index: 8, kind: input, shape index: {}]   ;;  %s6142_s9 = inlined_call_operand.vmem [shape: f32[5,10], index: 9, kind: input, shape index: {}]   ;;  %s6143_s10 = inlined_call_operand.vmem [shape: f32[160,80], index: 10, kind: input, shape index: {}]   ;;  %s6144_s11 = inlined_call_operand.vmem [shape: f32[160,80], index: 11, kind: input, shape index: {}]   ;;  %s6145_s12 = inlined_call_operand.vmem [shape: f32[1,80], index: 12, kind: input, shape index: {}]   ;;  %s6146_s13 = inlined_call_operand.vmem [shape: f32[5,80,120], index: 13, kind: input, shape index: {}]   ;;  %s6147_s14 = inlined_call_operand.vmem [shape: f32[1,120], index: 14, kind: input, shape index: {}]   ;;  %s6148_s15 = inlined_call_operand.vmem [shape: f32[120,84], index: 15, kind: input, shape index: {}]   ;;  %s6149_s16 = inlined_call_operand.vmem [shape: f32[1,84], index: 16, kind: input, shape index: {}]   ;;  %s6150_s17 = inlined_call_operand.vmem [shape: f32[84,10], index: 17, kind: input, shape index: {}]   ;;  %s6151_s18 = inlined_call_operand.vmem [shape: f32[1,10], index: 18, kind: input, shape index: {}]   ;;  %s6152_s19 = inlined_call_operand.hbm [shape: f32[2,1,10], index: 19, kind: output, shape index: {}]  }
   0x1   :  { %6163 = sst [smem:[#allocation11_spill]] %s6133_s0 }
   0x2   :  { %6164 = sst [smem:[#allocation12_spill]] %s6134_s1 }
   0x3   :  { %6165 = sst [smem:[#allocation13_spill]] %s6135_s2 }
   0x4   :  { %6166 = sst [smem:[#allocation14_spill]] %s6136_s3 }
   0x5   :  { %6167 = sst [smem:[#allocation15_spill]] %s6137_s4 }
   0x6   :  { %6168 = sst [smem:[#allocation16_spill]] %s6138_s5 }
   0x7   :  { %6169 = sst [smem:[#allocation17_spill]] %s6151_s18 }
   0x8   :  { %6170 = sst [smem:[#allocation18_spill]] %s6152_s19 }
   0x9   :  { %24 = vsyncpa [#allocation3], 0 }
   0xa   :  { %26 = vsyncpa [#allocation3 + $0x1], 0  ;;  %s4579_s0 = smov 0   ;;  %s4581_s30 = smov 0  }
   0xb   :  { %s4583_s20 = smov 0   ;;  %s4585_s21 = smov 0  }
   0xc LB: > { %6171 = sst [smem:[#allocation5_spill]] %s4460_s0  ;;  %s4600_s1 = sadd.s32 4294967295, %s4472_s21   ;;  %s4472_s21 = sphi %s4585_s21, %s6191_s21   ;;  %s4468_s20 = sphi %s4583_s20, %s6193_s20   ;;  %s4464_s30 = sphi %s4581_s30, %s6195_s30   ;;  %s4460_s0 = sphi %s4579_s0, %s6194_s0  }
   0xd   : > { %6172 = sst [smem:[#allocation6_spill]] %s4468_s20  ;;  %s3276_s22 = sadd.s32 4294967294, %s4472_s21  }
   0xe   : > { %6173 = sst [smem:[#allocation7_spill]] %s4472_s21  ;;  %s4604_s2 = sadd.s32 1, %s4472_s21  }
   0xf   : > { %6174 = sst [smem:[#allocation8_spill]] %s4604_s2  ;;  %s443_s23 = sadd.s32 1, %s4468_s20 }
  0x10   : > { %s440_s24 = ssub.s32 %s4472_s21, %s4604_s2  ;;  %p453_p0 = scmp.ne.s32.totalorder %s4468_s20, %s4464_s30 }
  0x11   : > { %p441_p1 = scmp.eq.s32.totalorder %s440_s24, 0  ;;  %p454_p2 = scmp.eq.s32.totalorder %s4600_s1, 1 }
  0x12   : > { %p459_p3 = scmp.ne.s32.totalorder %s4464_s30, %s4460_s0  ;;  %p460_p4 = scmp.eq.s32.totalorder %s3276_s22, 1 }
  0x13   : > { %s4615_s25 = scalar_select %p441_p1, %s4468_s20, %s443_s23  }
  0x14   : > { %p4617_p5 = por %p454_p2, %p453_p0  ;;  %p4621_p6 = por %p460_p4, %p459_p3 }
  0x15   : > { %6175 = sst [smem:[#allocation9_spill]] %s4615_s25  ;;  %p3279_p7 = scmp.ge.s32.totalorder %s4472_s21, 1 }
  0x16   : > { %s6177_s26 = scalar_select %p4621_p6, 1, 0 }
  0x17   : > { %p540_p8 = scmp.lt.s32.totalorder %s4472_s21, 3 }
  0x18   : > { %6178 = sst [smem:[#allocation10_spill]] %s6177_s26 }
  0x19   : > { %p541_p9 = pnand %p3279_p7, %p540_p8 }
  0x1a   : > { %s6179_s29 = sld [smem:[#allocation12_spill]] (!%p541_p9)  ;;  %v4474_v7 = vmov (!%p541_p9), 0.0   ;;  %p595_p10 = scmp.lt.s32.totalorder (!%p541_p9), %s4600_s1, 1  ;;  %vm657_vm0 = vcmask (!%p541_p9), 785408   ;;  %vm1283_vm1 = vcmask (!%p541_p9), 1043456   ;;  %vm4475_vm2 = vmmov (!%p541_p9), 1  }
  0x1b   : > { %544 = sbr.rel (%p541_p9) target bundleno = 2370 (0x942), region = 96  ;;  %734 = vmatprep.mubr.f32.mxu0 (!%p541_p9), %v4474_v7  ;;  %1354 = vmatprep.mubr.f32.mxu1 (!%p541_p9), %v4474_v7  ;;  %s6180_s28 = sld [smem:[#allocation11_spill]] (!%p541_p9)  ;;  %vm3961_vm3 = vmpackc.low (!%p541_p9), %vm1283_vm1, %vm4475_vm2  ;;  %vm1276_vm4 = vcmask (!%p541_p9), 228352   ;;  %vm1477_vm5 = vcmask (!%p541_p9), 326656   ;;  %vm1715_vm6 = vcmask (!%p541_p9), 1046528   ;;  %vm1719_vm7 = vcmask (!%p541_p9), 687104  }
  0x1c   : > { %s6181_s23 = sld [smem:[#allocation13_spill]] (!%p541_p9)  ;;  %s6182_s4 = sld [smem:[#allocation15_spill]] (!%p541_p9)  ;;  %vm1917_vm8 = vcmask (!%p541_p9), 1045504   ;;  %vm2035_vm9 = vcmask (!%p541_p9), 1044480   ;;  %vm2252_vm10 = vcmask (!%p541_p9), 1041408   ;;  %vm2248_vm12 = vcmask (!%p541_p9), 80896  }
  0x1d   : > { %s6184_s5 = sld [smem:[#allocation16_spill]] (!%p541_p9)  ;;  %vm4137_vm11 = vmpackc.low (!%p541_p9), %vm2252_vm10, %vm4475_vm2  ;;  %vm2427_vm13 = vcmask (!%p541_p9), 261120   ;;  %vm4477_vm14 = vmmov (!%p541_p9), 0   ;;  %vm2624_vm15 = vcmask (!%p541_p9), 654336   ;;  %s593_s18 = sand.u32 (!%p541_p9), 1, %s4464_s30  }
  0x1e   : > { %s6185_s21 = sld [smem:[#allocation17_spill]] (!%p541_p9)  ;;  %s3576_s24 = sshll.u32 (!%p541_p9), %s4600_s1, 4 }
  0x1f   : > { %s6186_s20 = sld [smem:[#allocation18_spill]] (!%p541_p9)  ;;  %s3209_s0 = scalar_lea.sflag (!%p541_p9), [#allocation3], %s593_s18 }
  0x20   : > { %v3283_v0 = vld [vmem:[%s6179_s29 + $0xc8] sm:$0xff] (!%p541_p9)  ;;  %v3285_v1 = vld [vmem:[%s6179_s29 + $0xd8] sm:$0xff] (!%p541_p9)  ;;  %v3282_v2 = vld [vmem:[%s6179_s29 + $0xc0] sm:$0xff] (!%p541_p9) }
  0x21   : > { %v3836_v3 = vpack.c.bf16 (!%p541_p9), %v3285_v1, %v3283_v0  ;;  %v3284_v4 = vld [vmem:[%s6179_s29 + $0xd0] sm:$0xff] (!%p541_p9)  ;;  %v3287_v5 = vld [vmem:[%s6179_s29 + $0xe8] sm:$0xff] (!%p541_p9)  ;;  %v3289_v6 = vld [vmem:[%s6179_s29 + $0xf8] sm:$0xff] (!%p541_p9) }
  0x22   : > { %v3838_v8 = vpack.c.bf16 %v3284_v4, %v3282_v2  ;;  %v3840_v9 = vpack.c.bf16 %v3289_v6, %v3287_v5  ;;  %v3286_v10 = vld [vmem:[%s6179_s29 + $0xe0] sm:$0xff]  ;;  %v3288_v11 = vld [vmem:[%s6179_s29 + $0xf0] sm:$0xff]  ;;  %v3291_v12 = vld [vmem:[%s6179_s29 + $0x108] sm:$0xff]  ;;  %s596_s27 = scalar_select %p595_p10, %s4600_s1, 1 }
  0x23   : > { %3837 = vmatprep.subr.bf16.mxu0 %v3836_v3  ;;  %v3293_v13 = vld [vmem:[%s6179_s29 + $0x118] sm:$0xff]  ;;  %v3842_v14 = vpack.c.bf16 %v3288_v11, %v3286_v10  ;;  %v3290_v16 = vld [vmem:[%s6179_s29 + $0x100] sm:$0xff]  ;;  %v3292_v17 = vld [vmem:[%s6179_s29 + $0x110] sm:$0xff]  ;;  %s4478_s1 = smov [#allocation2]  }
  0x24   : > { %3839 = vmatpush1.bf16.msra.mxu0 %v3838_v8  ;;  %v3844_v15 = vpack.c.bf16 %v3293_v13, %v3291_v12  ;;  %v3295_v18 = vld [vmem:[%s6179_s29 + $0x128] sm:$0xff]  ;;  %v3297_v19 = vld [vmem:[%s6179_s29 + $0x138] sm:$0xff]  ;;  %v3846_v20 = vpack.c.bf16 %v3292_v17, %v3290_v16  ;;  %v3294_v22 = vld [vmem:[%s6179_s29 + $0x120] sm:$0xff]  ;;  %s3579_s22 = sshll.u32 %s596_s27, 5  ;;  %s6183_s27 = sld [smem:[#allocation14_spill]] }
  0x25   : > { %3841 = vmatprep.subr.bf16.mxu0 %v3840_v9  ;;  %v3848_v21 = vpack.c.bf16 %v3297_v19, %v3295_v18  ;;  %v3296_v23 = vld [vmem:[%s6179_s29 + $0x130] sm:$0xff]  ;;  %v3299_v24 = vld [vmem:[%s6179_s29 + $0x148] sm:$0xff]  ;;  %v3301_v25 = vld [vmem:[%s6179_s29 + $0x158] sm:$0xff]  ;;  %s4712_s19 = scalar_lea.vmem %s6180_s28, %s3579_s22  ;;  %s6187_s2 = smov %s6186_s20 }
  0x26   : > { %v3850_v26 = vpack.c.bf16 %v3296_v23, %v3294_v22  ;;  %v3852_v27 = vpack.c.bf16 %v3301_v25, %v3299_v24  ;;  %v3298_v28 = vld [vmem:[%s6179_s29 + $0x140] sm:$0xff]  ;;  %v3300_v29 = vld [vmem:[%s6179_s29 + $0x150] sm:$0xff]  ;;  %v3303_v30 = vld [vmem:[%s6179_s29 + $0x168] sm:$0xff] }
  0x27   : > { %v3305_v31 = vld [vmem:[%s6179_s29 + $0x178] sm:$0xff]  ;;  %v3854_v32 = vpack.c.bf16 %v3300_v29, %v3298_v28  ;;  %v3302_v34 = vld [vmem:[%s6179_s29 + $0x160] sm:$0xff]  ;;  %v3304_v35 = vld [vmem:[%s6179_s29 + $0x170] sm:$0xff] }
  0x28   : > { %3843 = vmatpush1.bf16.msra.mxu0 %v3842_v14  ;;  %v3856_v33 = vpack.c.bf16 %v3305_v31, %v3303_v30  ;;  %v605_v36 = vld [vmem:[%s6179_s29 + $0x8] sm:$0xff]  ;;  %v607_v37 = vld [vmem:[%s6179_s29 + $0x18] sm:$0xff]  ;;  %v3858_v38 = vpack.c.bf16 %v3304_v35, %v3302_v34  ;;  %v604_v40 = vld [vmem:[%s6179_s29] sm:$0xff] }
  0x29   : > { %3845 = vmatprep.subr.bf16.mxu0 %v3844_v15  ;;  %v3860_v39 = vpack.c.bf16 %v607_v37, %v605_v36  ;;  %v606_v41 = vld [vmem:[%s6179_s29 + $0x10] sm:$0xff]  ;;  %v609_v42 = vld [vmem:[%s6179_s29 + $0x28] sm:$0xff]  ;;  %v611_v43 = vld [vmem:[%s6179_s29 + $0x38] sm:$0xff] }
  0x2a   : > { %v628_v44 = vld [vmem:[%s4712_s19 + $0x1] sm:$0xff]  ;;  %v3862_v45 = vpack.c.bf16 %v606_v41, %v604_v40  ;;  %v3864_v46 = vpack.c.bf16 %v611_v43, %v609_v42  ;;  %v610_v48 = vld [vmem:[%s6179_s29 + $0x30] sm:$0xff]  ;;  %v615_v50 = vld [vmem:[%s6179_s29 + $0x58] sm:$0xff] }
  0x2b   : > { %v608_v47 = vld [vmem:[%s6179_s29 + $0x20] sm:$0xff]  ;;  %v613_v49 = vld [vmem:[%s6179_s29 + $0x48] sm:$0xff]  ;;  %v614_v55 = vld [vmem:[%s6179_s29 + $0x50] sm:$0xff] }
  0x2c   : > { %3847 = vmatpush1.bf16.msra.mxu0 %v3846_v20  ;;  %v3866_v51 = vpack.c.bf16 %v610_v48, %v608_v47  ;;  %v629_v52 = vld [vmem:[%s4712_s19 + $0x9] sm:$0xff]  ;;  %v3868_v53 = vpack.c.bf16 %v615_v50, %v613_v49  ;;  %v612_v54 = vld [vmem:[%s6179_s29 + $0x40] sm:$0xff]  ;;  %v619_v57 = vld [vmem:[%s6179_s29 + $0x78] sm:$0xff] }
  0x2d   : > { %3849 = vmatprep.subr.bf16.mxu0 %v3848_v21  ;;  %v617_v56 = vld [vmem:[%s6179_s29 + $0x68] sm:$0xff]  ;;  %v3870_v58 = vpack.c.bf16 %v614_v55, %v612_v54  ;;  %v630_v59 = vld [vmem:[%s4712_s19 + $0x11] sm:$0xff]  ;;  %v616_v61 = vld [vmem:[%s6179_s29 + $0x60] sm:$0xff] }
  0x2e   : > { %v3872_v60 = vpack.c.bf16 %v619_v57, %v617_v56  ;;  %v618_v62 = vld [vmem:[%s6179_s29 + $0x70] sm:$0xff]  ;;  %v621_v63 = vld [vmem:[%s6179_s29 + $0x88] sm:$0xff]  ;;  %v623_v0 = vld [vmem:[%s6179_s29 + $0x98] sm:$0xff] }
  0x2f   : > { %v3874_v1 = vpack.c.bf16 %v618_v62, %v616_v61  ;;  %v631_v2 = vld [vmem:[%s4712_s19 + $0x19] sm:$0xf]  ;;  %v3876_v3 = vpack.c.bf16 %v623_v0, %v621_v63  ;;  %v620_v4 = vld [vmem:[%s6179_s29 + $0x80] sm:$0xff]  ;;  %v622_v5 = vld [vmem:[%s6179_s29 + $0x90] sm:$0xff] }
  0x30   : > { %3851 = vmatpush1.bf16.msra.mxu0 %v3850_v26  ;;  %v625_v6 = vld [vmem:[%s6179_s29 + $0xa8] sm:$0xff]  ;;  %v627_v8 = vld [vmem:[%s6179_s29 + $0xb8] sm:$0xff]  ;;  %v3878_v9 = vpack.c.bf16 %v622_v5, %v620_v4  ;;  %v624_v11 = vld [vmem:[%s6179_s29 + $0xa0] sm:$0xff] }
  0x31   : > { %3853 = vmatprep.subr.bf16.mxu0 %v3852_v27  ;;  %v3880_v10 = vpack.c.bf16 %v627_v8, %v625_v6  ;;  %v626_v12 = vld [vmem:[%s6179_s29 + $0xb0] sm:$0xff]  ;;  %v3315_v13 = vld [vmem:[%s6179_s29 + $0x188] sm:$0xff]  ;;  %v3317_v14 = vld [vmem:[%s6179_s29 + $0x198] sm:$0xff] }
  0x32   : > { %v3882_v15 = vpack.c.bf16 %v626_v12, %v624_v11  ;;  %v3884_v16 = vpack.c.bf16 %v3317_v14, %v3315_v13  ;;  %v3314_v17 = vld [vmem:[%s6179_s29 + $0x180] sm:$0xff]  ;;  %v3316_v18 = vld [vmem:[%s6179_s29 + $0x190] sm:$0xff]  ;;  %v3319_v19 = vld [vmem:[%s6179_s29 + $0x1a8] sm:$0xff] }
  0x33   : > { %v3321_v20 = vld [vmem:[%s6179_s29 + $0x1b8] sm:$0xff]  ;;  %v600_v21 = vld [vmem:[%s4712_s19] sm:$0xff]  ;;  %v3886_v22 = vpack.c.bf16 %v3316_v18, %v3314_v17  ;;  %v3320_v25 = vld [vmem:[%s6179_s29 + $0x1b0] sm:$0xff] }
  0x34   : > { %3855 = vmatpush1.bf16.msra.mxu0 %v3854_v32  ;;  %v3888_v23 = vpack.c.bf16 %v3321_v20, %v3319_v19  ;;  %v3318_v24 = vld [vmem:[%s6179_s29 + $0x1a0] sm:$0xff]  ;;  %v3323_v26 = vld [vmem:[%s6179_s29 + $0x1c8] sm:$0xff]  ;;  %v3325_v27 = vld [vmem:[%s6179_s29 + $0x1d8] sm:$0xff] }
  0x35   : > { %3857 = vmatprep.subr.bf16.mxu0 %v3856_v33  ;;  %v3890_v28 = vpack.c.bf16 %v3320_v25, %v3318_v24  ;;  %v601_v29 = vld [vmem:[%s4712_s19 + $0x8] sm:$0xff]  ;;  %v3892_v30 = vpack.c.bf16 %v3325_v27, %v3323_v26  ;;  %v3322_v31 = vld [vmem:[%s6179_s29 + $0x1c0] sm:$0xff]  ;;  %v3324_v32 = vld [vmem:[%s6179_s29 + $0x1d0] sm:$0xff] }
  0x36   : > { %v3327_v33 = vld [vmem:[%s6179_s29 + $0x1e8] sm:$0xff]  ;;  %v3329_v34 = vld [vmem:[%s6179_s29 + $0x1f8] sm:$0xff]  ;;  %v3894_v35 = vpack.c.bf16 %v3324_v32, %v3322_v31  ;;  %v602_v36 = vld [vmem:[%s4712_s19 + $0x10] sm:$0xff] }
  0x37   : > { %v3896_v37 = vpack.c.bf16 %v3329_v34, %v3327_v33  ;;  %v3331_v40 = vld [vmem:[%s6179_s29 + $0x208] sm:$0xff]  ;;  %v3333_v41 = vld [vmem:[%s6179_s29 + $0x218] sm:$0xff]  ;;  %v3342_v57 = vld [vmem:[%s6179_s29 + $0x240] sm:$0xff] }
  0x38   : > { %3859 = vmatpush1.bf16.msra.mxu0 %v3858_v38  ;;  %v3326_v38 = vld [vmem:[%s6179_s29 + $0x1e0] sm:$0xff]  ;;  %v603_v43 = vld [vmem:[%s4712_s19 + $0x18] sm:$0xf]  ;;  %v3335_v47 = vld [vmem:[%s6179_s29 + $0x228] sm:$0xff] }
  0x39   : > { %3861 = vmatprep.subr.bf16.mxu0 %v3860_v39  ;;  %v3328_v39 = vld [vmem:[%s6179_s29 + $0x1f0] sm:$0xff]  ;;  %v3337_v48 = vld [vmem:[%s6179_s29 + $0x238] sm:$0xff]  ;;  %v860_v61 = vld [vmem:[%s4712_s19 + $0x2] sm:$0xff] }
  0x3a   : > { %v3898_v42 = vpack.c.bf16 %v3328_v39, %v3326_v38  ;;  %v3904_v50 = vpack.c.bf16 %v3337_v48, %v3335_v47  ;;  %v3345_v54 = vld [vmem:[%s6179_s29 + $0x258] sm:$0xff]  ;;  %v3346_v0 = vld [vmem:[%s6179_s29 + $0x260] sm:$0xff]  ;;  %v861_v5 = vld [vmem:[%s4712_s19 + $0xa] sm:$0xff] }
  0x3b   : > { %3306 = vmatmul.mubr.msk.f32.vlgmr.msra.gmra.mrb[0].mxu0 %vm657_vm0, %v628_v44  ;;  %v3900_v44 = vpack.c.bf16 %v3333_v41, %v3331_v40  ;;  %v3350_v8 = vld [vmem:[%s6179_s29 + $0x280] sm:$0xff]  ;;  %v3357_v11 = vld [vmem:[%s6179_s29 + $0x2b8] sm:$0xff]  ;;  %v3359_v17 = vld [vmem:[%s6179_s29 + $0x2c8] sm:$0xff] }
  0x3c   : > { %3863 = vmatpush1.bf16.msra.mxu0 %v3862_v45  ;;  %740 = vmatprep.mubr.f32.mxu0 %v4474_v7  ;;  %v3330_v45 = vld [vmem:[%s6179_s29 + $0x200] sm:$0xff]  ;;  %v862_v13 = vld [vmem:[%s4712_s19 + $0x12] sm:$0xff]  ;;  %v863_v20 = vld [vmem:[%s4712_s19 + $0x1a] sm:$0xf] }
  0x3d   : > { %3865 = vmatprep.subr.bf16.mxu0 %v3864_v46  ;;  %v3332_v46 = vld [vmem:[%s6179_s29 + $0x210] sm:$0xff]  ;;  %v3361_v18 = vld [vmem:[%s6179_s29 + $0x2d8] sm:$0xff]  ;;  %v3363_v24 = vld [vmem:[%s6179_s29 + $0x2e8] sm:$0xff] }
  0x3e   : > { %v3902_v49 = vpack.c.bf16 %v3332_v46, %v3330_v45  ;;  %v3365_v25 = vld [vmem:[%s6179_s29 + $0x2f8] sm:$0xff]  ;;  %v3370_v34 = vld [vmem:[%s6179_s29 + $0x300] sm:$0xff]  ;;  %v999_v46 = vld [vmem:[%s4712_s19 + $0xb] sm:$0xff] }
  0x3f   : > { %3307 = vmatmul.mubr.msk.f32.gmra.mrb[2].mxu0 %vm657_vm0, %v629_v52  ;;  %v3336_v52 = vld [vmem:[%s6179_s29 + $0x230] sm:$0xff]  ;;  %v3928_v27 = vpack.c.bf16 %v3365_v25, %v3363_v24  ;;  %v3373_v31 = vld [vmem:[%s6179_s29 + $0x318] sm:$0xff]  ;;  %v998_v38 = vld [vmem:[%s4712_s19 + $0x3] sm:$0xff] }
  0x40   : > { %3867 = vmatpush1.bf16.msra.mxu0 %v3866_v51  ;;  %746 = vmatprep.mubr.f32.mxu0 %v4474_v7  ;;  %v3334_v51 = vld [vmem:[%s6179_s29 + $0x220] sm:$0xff]  ;;  %v1275_v25 = vld [vmem:[%s6181_s23 + $0x8] sm:$0x3f] }
  0x41   : > { %3869 = vmatprep.subr.bf16.mxu0 %v3868_v53  ;;  %v3343_v53 = vld [vmem:[%s6179_s29 + $0x248] sm:$0xff]  ;;  %v3906_v55 = vpack.c.bf16 %v3336_v52, %v3334_v51  ;;  %v3374_v41 = vld [vmem:[%s6179_s29 + $0x320] sm:$0xff]  ;;  %v3385_v51 = vld [vmem:[%s6179_s29 + $0x378] sm:$0xff] }
  0x42   : > { %v3908_v56 = vpack.c.bf16 %v3345_v54, %v3343_v53  ;;  %v3378_v48 = vld [vmem:[%s6179_s29 + $0x340] sm:$0xff]  ;;  %v1000_v53 = vld [vmem:[%s4712_s19 + $0x13] sm:$0xff] }
  0x43   : > { %3308 = vmatmul.mubr.msk.f32.gmra.mrb[4].mxu0 %vm657_vm0, %v630_v59  ;;  %v3347_v59 = vld [vmem:[%s6179_s29 + $0x268] sm:$0xff]  ;;  %v1274_v24 = vld [vmem:[%s6181_s23] sm:$0xff] }
  0x44   : > { %3871 = vmatpush1.bf16.msra.mxu0 %v3870_v58  ;;  %752 = vmatprep.mubr.f32.mxu0 %v4474_v7  ;;  %v3344_v58 = vld [vmem:[%s6179_s29 + $0x250] sm:$0xff] }
  0x45   : > { %3873 = vmatprep.subr.bf16.mxu0 %v3872_v60  ;;  %v3349_v60 = vld [vmem:[%s6179_s29 + $0x278] sm:$0xff]  ;;  %v3910_v62 = vpack.c.bf16 %v3344_v58, %v3342_v57  ;;  %v3387_v57 = vld [vmem:[%s6179_s29 + $0x388] sm:$0xff] }
  0x46   : > { %v3912_v63 = vpack.c.bf16 %v3349_v60, %v3347_v59  ;;  %v3389_v58 = vld [vmem:[%s6179_s29 + $0x398] sm:$0xff] }
  0x47   : > { %3309 = vmatmul.mubr.msk.f32.gmra.mrb[6].mxu0 %vm657_vm0, %v631_v2  ;;  %v3351_v2 = vld [vmem:[%s6179_s29 + $0x288] sm:$0xff]  ;;  %v1001_v60 = vld [vmem:[%s4712_s19 + $0x1b] sm:$0xf] }
  0x48   : > { %3875 = vmatpush1.bf16.msra.mxu0 %v3874_v1  ;;  %835 = vmatprep.mubr.f32.mxu0 %v4474_v7  ;;  %v3348_v1 = vld [vmem:[%s6179_s29 + $0x270] sm:$0xff] }
  0x49   : > { %3877 = vmatprep.subr.bf16.mxu0 %v3876_v3  ;;  %v3353_v3 = vld [vmem:[%s6179_s29 + $0x298] sm:$0xff]  ;;  %v3914_v4 = vpack.c.bf16 %v3348_v1, %v3346_v0  ;;  %v3391_v0 = vld [vmem:[%s6179_s29 + $0x3a8] sm:$0xff] }
  0x4a   : > { %v3916_v6 = vpack.c.bf16 %v3353_v3, %v3351_v2  ;;  %v3393_v1 = vld [vmem:[%s6179_s29 + $0x3b8] sm:$0xff] }
  0x4b   : > { %v3952_v3 = vpack.c.bf16 %v3393_v1, %v3391_v0  ;;  %v1559_v0 = vld [vmem:[%s6184_s5] sm:$0xff]  ;;  %v1560_v1 = vld [vmem:[%s6184_s5 + $0x8] sm:$0xff] }
  0x4c   : > { %3879 = vmatpush1.bf16.msra.mxu0 %v3878_v9  ;;  %v3352_v9 = vld [vmem:[%s6179_s29 + $0x290] sm:$0xff] }
  0x4d   : > { %3881 = vmatprep.subr.bf16.mxu0 %v3880_v10  ;;  %v3355_v10 = vld [vmem:[%s6179_s29 + $0x2a8] sm:$0xff]  ;;  %v3918_v12 = vpack.c.bf16 %v3352_v9, %v3350_v8 }
  0x4e   : > { %v3920_v14 = vpack.c.bf16 %v3357_v11, %v3355_v10  ;;  %v1136_v8 = vld [vmem:[%s4712_s19 + $0x4] sm:$0xff]  ;;  %v1137_v9 = vld [vmem:[%s4712_s19 + $0xc] sm:$0xff]  ;;  %v1138_v10 = vld [vmem:[%s4712_s19 + $0x14] sm:$0xff] }
  0x4f   : > { %v1139_v11 = vld [vmem:[%s4712_s19 + $0x1c] sm:$0xf]  ;;  %s594_s19 = scalar_lea.vmem [#allocation2], %s593_s18 }
  0x50   : > { %3883 = vmatpush1.bf16.msra.mxu0 %v3882_v15  ;;  %v3354_v15 = vld [vmem:[%s6179_s29 + $0x2a0] sm:$0xff]  ;;  %s3221_s22 = sshll.u32 %s594_s19, 4  ;;  %s6093_s22 = int_to_ptr.vmem [resolvable:$true] %s3221_s22 }
  0x51   : > { %3885 = vmatprep.subr.bf16.mxu0 %v3884_v16  ;;  %v3356_v16 = vld [vmem:[%s6179_s29 + $0x2b0] sm:$0xff]  ;;  %s4410_s26 = scalar_lea.vmem %s6093_s22, 16 }
  0x52   : > { %v3922_v19 = vpack.c.bf16 %v3356_v16, %v3354_v15  ;;  %p4411_p11 = scmp.ne.s32.totalorder %s6093_s22, %s4410_s26 }
  0x53   : > { %3310 = vmatmul.mubr.msk.f32.vlgmr.msra.gmra.mrb[0].mxu0 %vm657_vm0, %v600_v21  ;;  %v3924_v21 = vpack.c.bf16 %v3361_v18, %v3359_v17 }
  0x54   : > { %3887 = vmatpush1.bf16.msra.mxu0 %v3886_v22  ;;  %841 = vmatprep.mubr.f32.mxu0 %v4474_v7  ;;  %v3358_v22 = vld [vmem:[%s6179_s29 + $0x2c0] sm:$0xff]  ;;  %p4412_p12 = pnand %p4411_p11, %p4617_p5 }
  0x55   : > { %3889 = vmatprep.subr.bf16.mxu0 %v3888_v23  ;;  %v3360_v23 = vld [vmem:[%s6179_s29 + $0x2d0] sm:$0xff] }
  0x56   : > { %v3926_v26 = vpack.c.bf16 %v3360_v23, %v3358_v22  ;;  %p4413_p13 = pneg %p4412_p12 }
  0x57   : > { %3311 = vmatmul.mubr.msk.f32.gmra.mrb[2].mxu0 %vm657_vm0, %v601_v29  ;;  %v3364_v29 = vld [vmem:[%s6179_s29 + $0x2f0] sm:$0xff] }
  0x58   : > { %3891 = vmatpush1.bf16.msra.mxu0 %v3890_v28  ;;  %847 = vmatprep.mubr.f32.mxu0 %v4474_v7  ;;  %v3362_v28 = vld [vmem:[%s6179_s29 + $0x2e0] sm:$0xff] }
  0x59   : > { %3893 = vmatprep.subr.bf16.mxu0 %v3892_v30  ;;  %v3371_v30 = vld [vmem:[%s6179_s29 + $0x308] sm:$0xff]  ;;  %v3930_v32 = vpack.c.bf16 %v3364_v29, %v3362_v28  ;;  %v1367_v28 = vld [vmem:[%s6183_s27] sm:$0xff] }
  0x5a   : > { %v3932_v33 = vpack.c.bf16 %v3373_v31, %v3371_v30  ;;  %v4476_v30 = vmov 0.0|0.0   ;;  %v1458_v31 = vld [vmem:[%s6182_s4 + $0x10] sm:$0xff] }
  0x5b   : > { %3312 = vmatmul.mubr.msk.f32.gmra.mrb[4].mxu0 %vm657_vm0, %v602_v36  ;;  %v3375_v36 = vld [vmem:[%s6179_s29 + $0x328] sm:$0xff] }
  0x5c   : > { %3895 = vmatpush1.bf16.msra.mxu0 %v3894_v35  ;;  %853 = vmatprep.mubr.f32.mxu0 %v4474_v7  ;;  %v3372_v35 = vld [vmem:[%s6179_s29 + $0x310] sm:$0xff] }
  0x5d   : > { %3897 = vmatprep.subr.bf16.mxu0 %v3896_v37  ;;  %v3377_v37 = vld [vmem:[%s6179_s29 + $0x338] sm:$0xff]  ;;  %v3934_v39 = vpack.c.bf16 %v3372_v35, %v3370_v34  ;;  %v1460_v35 = vld [vmem:[%s6182_s4 + $0x20] sm:$0xff] }
  0x5e   : > { %v3936_v40 = vpack.c.bf16 %v3377_v37, %v3375_v36  ;;  %v1461_v36 = vld [vmem:[%s6182_s4 + $0x28] sm:$0xff] }
  0x5f   : > { %3313 = vmatmul.mubr.msk.f32.gmra.mrb[6].mxu0 %vm657_vm0, %v603_v43  ;;  %v3379_v43 = vld [vmem:[%s6179_s29 + $0x348] sm:$0xff]  ;;  %v3983_v37 = vpack.c.bf16 %v1461_v36, %v1460_v35 }
  0x60   : > { %3899 = vmatpush1.bf16.msra.mxu0 %v3898_v42  ;;  %965 = vmatprep.mubr.f32.mxu0 %v4474_v7  ;;  %v3376_v42 = vld [vmem:[%s6179_s29 + $0x330] sm:$0xff]  ;;  %v1576_v35 = vld [vmem:[%s6184_s5 + $0x88] sm:$0xff] }
  0x61   : > { %3901 = vmatprep.subr.bf16.mxu0 %v3900_v44  ;;  %v3381_v44 = vld [vmem:[%s6179_s29 + $0x358] sm:$0xff]  ;;  %v3938_v45 = vpack.c.bf16 %v3376_v42, %v3374_v41  ;;  %v1464_v41 = vld [vmem:[%s6182_s4 + $0x40] sm:$0xff]  ;;  %v1465_v42 = vld [vmem:[%s6182_s4 + $0x48] sm:$0xff] }
  0x62   : > { %v3940_v47 = vpack.c.bf16 %v3381_v44, %v3379_v43  ;;  %v3989_v43 = vpack.c.bf16 %v1465_v42, %v1464_v41  ;;  %v1466_v44 = vld [vmem:[%s6182_s4 + $0x50] sm:$0xff]  ;;  %v3412_v41 = vld [vmem:[%s6140_s7 + $0xb8] sm:$0xff]  ;;  %v3414_v42 = vld [vmem:[%s6140_s7 + $0xc8] sm:$0xff] }
  0x64   : > { %3903 = vmatpush1.bf16.msra.mxu0 %v3902_v49  ;;  %v3380_v49 = vld [vmem:[%s6179_s29 + $0x350] sm:$0xff] }
  0x65   : > { %3905 = vmatprep.subr.bf16.mxu0 %v3904_v50  ;;  %v3383_v50 = vld [vmem:[%s6179_s29 + $0x368] sm:$0xff]  ;;  %v3942_v52 = vpack.c.bf16 %v3380_v49, %v3378_v48 }
  0x66   : > { %v3944_v54 = vpack.c.bf16 %v3385_v51, %v3383_v50  ;;  %v1469_v48 = vld [vmem:[%s6182_s4 + $0x68] sm:$0xff]  ;;  %v1470_v50 = vld [vmem:[%s6182_s4 + $0x70] sm:$0xff]  ;;  %v1471_v51 = vld [vmem:[%s6182_s4 + $0x78] sm:$0xff] }
  0x68   : > { %3907 = vmatpush1.bf16.msra.mxu0 %v3906_v55  ;;  %v3382_v55 = vld [vmem:[%s6179_s29 + $0x360] sm:$0xff] }
  0x69   : > { %3909 = vmatprep.subr.bf16.mxu0 %v3908_v56  ;;  %v3384_v56 = vld [vmem:[%s6179_s29 + $0x370] sm:$0xff] }
  0x6a   : > { %v3946_v59 = vpack.c.bf16 %v3384_v56, %v3382_v55  ;;  %v1474_v56 = vld [vmem:[%s6182_s4 + $0x90] sm:$0xff] }
  0x6b   : > { %3338 = vmatmul.mubr.msk.f32.vlgmr.msra.gmra.mrb[0].mxu0 %vm657_vm0, %v860_v61  ;;  %v3948_v61 = vpack.c.bf16 %v3389_v58, %v3387_v57  ;;  %v1475_v57 = vld [vmem:[%s6182_s4 + $0x98] sm:$0xff] }
  0x6c   : > { %3911 = vmatpush1.bf16.msra.mxu0 %v3910_v62  ;;  %971 = vmatprep.mubr.f32.mxu0 %v4474_v7  ;;  %v3386_v62 = vld [vmem:[%s6179_s29 + $0x380] sm:$0xff]  ;;  %v4004_v58 = vpack.c.bf16 %v1475_v57, %v1474_v56  ;;  %v3419_v56 = vld [vmem:[%s6140_s7 + $0xf0] sm:$0xff] }
  0x6d   : > { %3913 = vmatprep.subr.bf16.mxu0 %v3912_v63  ;;  %v3388_v63 = vld [vmem:[%s6179_s29 + $0x390] sm:$0xff]  ;;  %v3421_v57 = vld [vmem:[%s6140_s7 + $0x100] sm:$0xff] }
  0x6e   : > { %v3950_v2 = vpack.c.bf16 %v3388_v63, %v3386_v62 }
  0x6f   : > { %3339 = vmatmul.mubr.msk.f32.gmra.mrb[2].mxu0 %vm657_vm0, %v861_v5  ;;  %v3392_v5 = vld [vmem:[%s6179_s29 + $0x3b0] sm:$0xff] }
  0x70   : > { %3915 = vmatpush1.bf16.msra.mxu0 %v3914_v4  ;;  %977 = vmatprep.mubr.f32.mxu0 %v4474_v7  ;;  %v3390_v4 = vld [vmem:[%s6179_s29 + $0x3a0] sm:$0xff] }
  0x71   : > { %3917 = vmatprep.subr.bf16.mxu0 %v3916_v6  ;;  %v3954_v6 = vpack.c.bf16 %v3392_v5, %v3390_v4 }
  0x73   : > { %3340 = vmatmul.mubr.msk.f32.gmra.mrb[4].mxu0 %vm657_vm0, %v862_v13 }
  0x74   : > { %3919 = vmatpush1.bf16.msra.mxu0 %v3918_v12  ;;  %983 = vmatprep.mubr.f32.mxu0 %v4474_v7 }
  0x75   : > { %3921 = vmatprep.subr.bf16.mxu0 %v3920_v14 }
  0x77   : > { %3341 = vmatmul.mubr.msk.f32.gmra.mrb[6].mxu0 %vm657_vm0, %v863_v20 }
  0x78   : > { %3923 = vmatpush1.bf16.msra.mxu0 %v3922_v19  ;;  %1103 = vmatprep.mubr.f32.mxu0 %v4474_v7 }
  0x79   : > { %3925 = vmatprep.subr.bf16.mxu0 %v3924_v21 }
  0x7c   : > { %3927 = vmatpush1.bf16.msra.mxu0 %v3926_v26  ;;  %v1456_v26 = vld [vmem:[%s6182_s4] sm:$0xff] }
  0x7d   : > { %3929 = vmatprep.subr.bf16.mxu0 %v3928_v27  ;;  %v1457_v27 = vld [vmem:[%s6182_s4 + $0x8] sm:$0xff] }
  0x7e   : > { %v3977_v29 = vpack.c.bf16 %v1457_v27, %v1456_v26  ;;  %v1571_v27 = vld [vmem:[%s6184_s5 + $0x60] sm:$0xff] }
  0x80   : > { %3931 = vmatpush1.bf16.msra.mxu0 %v3930_v32  ;;  %v1459_v32 = vld [vmem:[%s6182_s4 + $0x18] sm:$0xff] }
  0x81   : > { %3933 = vmatprep.subr.bf16.mxu0 %v3932_v33  ;;  %v1368_v33 = vld [vmem:[%s6183_s27 + $0x8] sm:$0x3f]  ;;  %v3980_v34 = vpack.c.bf16 %v1459_v32, %v1458_v31  ;;  %v1573_v31 = vld [vmem:[%s6184_s5 + $0x70] sm:$0xff]  ;;  %v1574_v32 = vld [vmem:[%s6184_s5 + $0x78] sm:$0xff] }
  0x83   : > { %3366 = vmatmul.mubr.msk.f32.vlgmr.msra.gmra.mrb[0].mxu0 %vm657_vm0, %v998_v38  ;;  %v1462_v38 = vld [vmem:[%s6182_s4 + $0x30] sm:$0xff] }
  0x84   : > { %3935 = vmatpush1.bf16.msra.mxu0 %v3934_v39  ;;  %1109 = vmatprep.mubr.f32.mxu0 %v4474_v7  ;;  %v1463_v39 = vld [vmem:[%s6182_s4 + $0x38] sm:$0xff] }
  0x85   : > { %3937 = vmatprep.subr.bf16.mxu0 %v3936_v40  ;;  %v3986_v40 = vpack.c.bf16 %v1463_v39, %v1462_v38  ;;  %v1578_v38 = vld [vmem:[%s6184_s5 + $0x98] sm:$0xff] }
  0x87   : > { %3367 = vmatmul.mubr.msk.f32.gmra.mrb[2].mxu0 %vm657_vm0, %v999_v46 }
  0x88   : > { %3939 = vmatpush1.bf16.msra.mxu0 %v3938_v45  ;;  %1115 = vmatprep.mubr.f32.mxu0 %v4474_v7  ;;  %v1467_v45 = vld [vmem:[%s6182_s4 + $0x58] sm:$0xff] }
  0x89   : > { %3941 = vmatprep.subr.bf16.mxu0 %v3940_v47  ;;  %v3992_v46 = vpack.c.bf16 %v1467_v45, %v1466_v44  ;;  %v1468_v47 = vld [vmem:[%s6182_s4 + $0x60] sm:$0xff]  ;;  %v4036_v44 = vpack.c.bf16 %v3414_v42, %v3412_v41 }
  0x8a   : > { %v3995_v49 = vpack.c.bf16 %v1469_v48, %v1468_v47  ;;  %v3413_v45 = vld [vmem:[%s6140_s7 + $0xc0] sm:$0xff]  ;;  %v3418_v47 = vld [vmem:[%s6140_s7 + $0xe8] sm:$0xff] }
  0x8b   : > { %3368 = vmatmul.mubr.msk.f32.gmra.mrb[4].mxu0 %vm657_vm0, %v1000_v53  ;;  %v1472_v53 = vld [vmem:[%s6182_s4 + $0x80] sm:$0xff] }
  0x8c   : > { %3943 = vmatpush1.bf16.msra.mxu0 %v3942_v52  ;;  %1121 = vmatprep.mubr.f32.mxu0 %v4474_v7  ;;  %v3998_v52 = vpack.c.bf16 %v1471_v51, %v1470_v50  ;;  %v3415_v50 = vld [vmem:[%s6140_s7 + $0xd0] sm:$0xff]  ;;  %v3417_v51 = vld [vmem:[%s6140_s7 + $0xe0] sm:$0xff] }
  0x8d   : > { %3945 = vmatprep.subr.bf16.mxu0 %v3944_v54  ;;  %v1473_v54 = vld [vmem:[%s6182_s4 + $0x88] sm:$0xff] }
  0x8e   : > { %v4001_v55 = vpack.c.bf16 %v1473_v54, %v1472_v53  ;;  %v3422_v53 = vld [vmem:[%s6140_s7 + $0x108] sm:$0xff]  ;;  %v4042_v54 = vpack.c.bf16 %v3417_v51, %v3415_v50 }
  0x8f   : > { %3369 = vmatmul.mubr.msk.f32.gmra.mrb[6].mxu0 %vm657_vm0, %v1001_v60 }
  0x90   : > { %3947 = vmatpush1.bf16.msra.mxu0 %v3946_v59  ;;  %1241 = vmatprep.mubr.f32.mxu0 %v4474_v7  ;;  %v1476_v59 = vld [vmem:[%s6182_s4 + $0xa0] sm:$0xff]  ;;  %s6091_s4 = scalar_lea.hbm %s6186_s20, %s3576_s24 }
  0x91   : > { %3949 = vmatprep.subr.bf16.mxu0 %v3948_v61 }
  0x94   : > { %3951 = vmatpush1.bf16.msra.mxu0 %v3950_v2 }
  0x95   : > { %3953 = vmatprep.subr.bf16.mxu0 %v3952_v3 }
  0x98   : > { %3955 = vmatpush1.bf16.msra.mxu0 %v3954_v6  ;;  %v4007_v6 = vpack.c.bf16 %v1560_v1, %v1559_v0  ;;  %v3428_v1 = vld [vmem:[%s6140_s7 + $0x138] sm:$0xff] }
  0x9b   : > { %3394 = vmatmul.mubr.msk.f32.vlgmr.msra.gmra.mrb[0].mxu0 %vm657_vm0, %v1136_v8  ;;  %v1561_v8 = vld [vmem:[%s6184_s5 + $0x10] sm:$0xff] }
  0x9c   : > { %1247 = vmatprep.mubr.f32.mxu0 %v4474_v7 }
  0x9f   : > { %3395 = vmatmul.mubr.msk.f32.gmra.mrb[2].mxu0 %vm657_vm0, %v1137_v9  ;;  %v1562_v9 = vld [vmem:[%s6184_s5 + $0x18] sm:$0xff] }
  0xa0   : > { %1253 = vmatprep.mubr.f32.mxu0 %v4474_v7 }
  0xa3   : > { %3396 = vmatmul.mubr.msk.f32.gmra.mrb[4].mxu0 %vm657_vm0, %v1138_v10 }
  0xa4   : > { %1259 = vmatprep.mubr.f32.mxu0 %v4474_v7 }
  0xa7   : > { %3397 = vmatmul.mubr.msk.f32.gmra.mrb[6].mxu0 %vm657_vm0, %v1139_v11  ;;  %vm3043_vm0 = vcmask 982016  }
  0xa8   : > { %2323 = vmatprep.mubr.f32.mxu0 %v4474_v7 }
 0x16e   : > { %v1243_v12 = vpop.f32.mrb[0].mxu0 }
 0x16f   : > { %v1245_v13 = vpop.f32.mrb[1].mxu0 }
 0x172   : > { %v1249_v14 = vpop.f32.mrb[2].mxu0 }
 0x173   : > { %v3958_v15 = vpack.c.bf16 %v1249_v14, %v1243_v12  ;;  %v1251_v16 = vpop.f32.mrb[3].mxu0  ;;  %v4010_v14 = vpack.c.bf16 %v1562_v9, %v1561_v8  ;;  %v3432_v8 = vld [vmem:[%s6140_s7 + $0x158] sm:$0xf]  ;;  %v3431_v9 = vld [vmem:[%s6140_s7 + $0x150] sm:$0xf] }
 0x174   : > { %v3956_v17 = vpack.c.bf16 %v1251_v16, %v1245_v13  ;;  %v1564_v16 = vld [vmem:[%s6184_s5 + $0x28] sm:$0xff] }
 0x176   : > { %v1255_v18 = vpop.f32.mrb[4].mxu0  ;;  %3957 = vmatprep.subr.bf16.mxu1 %v3956_v17 }
 0x177   : > { %v1257_v19 = vpop.f32.mrb[5].mxu0  ;;  %3959 = vmatpush1.bf16.msra.mxu1 %v3958_v15 }
 0x17a   : > { %v1261_v20 = vpop.f32.mrb[6].mxu0 }
 0x17b   : > { %v3963_v21 = vpack.c.bf16 %v1261_v20, %v1255_v18  ;;  %v1263_v22 = vpop.f32.mrb[7].mxu0  ;;  %v1565_v18 = vld [vmem:[%s6184_s5 + $0x30] sm:$0xff] }
 0x17c   : > { %v3960_v23 = vpack.c.bf16 %v1263_v22, %v1257_v19  ;;  %v1566_v19 = vld [vmem:[%s6184_s5 + $0x38] sm:$0xff]  ;;  %v1568_v22 = vld [vmem:[%s6184_s5 + $0x48] sm:$0xff] }
 0x17d   : > { %v4016_v20 = vpack.c.bf16 %v1566_v19, %v1565_v18  ;;  %v3410_v18 = vld [vmem:[%s6139_s6] ss:$0 sm:$0xff] }
 0x17e   : > { %3962 = vmatprep.subr.msk.bf16.mxu1 %vm3961_vm3, %v3960_v23 }
 0x17f   : > { %3965 = vmatpush1.bf16.msk.msra.mxu1 %vm3961_vm3, %v3963_v21 }
 0x180   : > { %3967 = vmatprep.subr.bf16.mxu1 %v3956_v17 }
 0x182   : > { %3400 = vmatmul.mubr.msk.f32.vlgmr.msra.gmra.mrb[0].mxu1 %vm1276_vm4, %v1274_v24  ;;  %v1569_v24 = vld [vmem:[%s6184_s5 + $0x50] sm:$0xff] }
 0x183   : > { %3969 = vmatpush1.bf16.msra.mxu1 %v3958_v15  ;;  %1360 = vmatprep.mubr.f32.mxu1 %v4474_v7  ;;  %v1563_v15 = vld [vmem:[%s6184_s5 + $0x20] sm:$0xff] }
 0x184   : > { %3972 = vmatprep.subr.msk.bf16.mxu1 %vm3961_vm3, %v3960_v23  ;;  %v4013_v17 = vpack.c.bf16 %v1564_v16, %v1563_v15 }
 0x186   : > { %3401 = vmatmul.mubr.msk.f32.gmra.mrb[2].mxu1 %vm1276_vm4, %v1275_v25  ;;  %v1570_v25 = vld [vmem:[%s6184_s5 + $0x58] sm:$0xff] }
 0x187   : > { %3975 = vmatpush1.bf16.msk.msra.mxu1 %vm3961_vm3, %v3963_v21  ;;  %1439 = vmatprep.mubr.f32.mxu1 %v4474_v7  ;;  %v1567_v21 = vld [vmem:[%s6184_s5 + $0x40] sm:$0xff]  ;;  %v4022_v26 = vpack.c.bf16 %v1570_v25, %v1569_v24 }
 0x188   : > { %3976 = vmatprep.subr.bf16.mxu1 %v4476_v30  ;;  %v4019_v23 = vpack.c.bf16 %v1568_v22, %v1567_v21  ;;  %v1668_v25 = vld [vmem:[%s6140_s7] sm:$0xff] }
 0x18a   : > { %3404 = vmatmul.mubr.msk.f32.vlgmr.msra.gmra.mrb[4].mxu1 %vm1276_vm4, %v1367_v28  ;;  %v1572_v28 = vld [vmem:[%s6184_s5 + $0x68] sm:$0xff] }
 0x18b   : > { %1445 = vmatprep.mubr.f32.mxu1 %v4474_v7  ;;  %3978 = vmatpush1.bf16.msra.mxu1 %v3977_v29  ;;  %v4025_v29 = vpack.c.bf16 %v1572_v28, %v1571_v27 }
 0x18c   : > { %3979 = vmatprep.subr.bf16.mxu1 %v4476_v30 }
 0x18e   : > { %3405 = vmatmul.mubr.msk.f32.gmra.mrb[6].mxu1 %vm1276_vm4, %v1368_v33  ;;  %v4028_v33 = vpack.c.bf16 %v1574_v32, %v1573_v31  ;;  %v1673_v32 = vld [vmem:[%s6140_s7 + $0x28] sm:$0xff] }
 0x18f   : > { %3981 = vmatpush1.bf16.msra.mxu1 %v3980_v34  ;;  %v1575_v34 = vld [vmem:[%s6184_s5 + $0x80] sm:$0xff] }
 0x190   : > { %3982 = vmatprep.subr.bf16.mxu1 %v4476_v30  ;;  %v4031_v36 = vpack.c.bf16 %v1576_v35, %v1575_v34 }
 0x193   : > { %3984 = vmatpush1.bf16.msra.mxu1 %v3983_v37  ;;  %v1577_v37 = vld [vmem:[%s6184_s5 + $0x90] sm:$0xff] }
 0x194   : > { %3985 = vmatprep.subr.bf16.mxu1 %v4476_v30  ;;  %v4034_v39 = vpack.c.bf16 %v1578_v38, %v1577_v37 }
 0x197   : > { %3987 = vmatpush1.bf16.msra.mxu1 %v3986_v40  ;;  %v1579_v40 = vld [vmem:[%s6184_s5 + $0xa0] sm:$0xff] }
 0x198   : > { %3988 = vmatprep.subr.bf16.mxu1 %v4476_v30 }
 0x19b   : > { %3990 = vmatpush1.bf16.msra.mxu1 %v3989_v43  ;;  %v3411_v43 = vld [vmem:[%s6140_s7 + $0xb0] sm:$0xff] }
 0x19c   : > { %3991 = vmatprep.subr.bf16.mxu1 %v4476_v30  ;;  %v4038_v48 = vpack.c.bf16 %v3413_v45, %v3411_v43  ;;  %v1672_v43 = vld [vmem:[%s6140_s7 + $0x20] sm:$0xff] }
 0x19f   : > { %3993 = vmatpush1.bf16.msra.mxu1 %v3992_v46  ;;  %v3416_v46 = vld [vmem:[%s6140_s7 + $0xd8] sm:$0xff] }
 0x1a0   : > { %3994 = vmatprep.subr.bf16.mxu1 %v4476_v30 }
 0x1a3   : > { %3996 = vmatpush1.bf16.msra.mxu1 %v3995_v49  ;;  %v4040_v49 = vpack.c.bf16 %v3418_v47, %v3416_v46  ;;  %v1677_v46 = vld [vmem:[%s6140_s7 + $0x48] sm:$0xff]  ;;  %v1679_v47 = vld [vmem:[%s6140_s7 + $0x58] sm:$0xff] }
 0x1a4   : > { %3997 = vmatprep.subr.bf16.mxu1 %v4476_v30 }
 0x1a7   : > { %3999 = vmatpush1.bf16.msra.mxu1 %v3998_v52  ;;  %v3420_v52 = vld [vmem:[%s6140_s7 + $0xf8] sm:$0xff] }
 0x1a8   : > { %4000 = vmatprep.subr.bf16.mxu1 %v4476_v30 }
 0x1ab   : > { %4002 = vmatpush1.bf16.msra.mxu1 %v4001_v55  ;;  %v4044_v55 = vpack.c.bf16 %v3422_v53, %v3420_v52  ;;  %v4064_v52 = vpack.c.bf16 %v1679_v47, %v1677_v46  ;;  %v1676_v53 = vld [vmem:[%s6140_s7 + $0x40] sm:$0xff]  ;;  %v3472_v47 = vld [vmem:[%s6140_s7 + $0x238] sm:$0xff] }
 0x1ac   : > { %4003 = vmatprep.subr.bf16.mxu1 %v4476_v30  ;;  %v3469_v46 = vld [vmem:[%s6140_s7 + $0x220] sm:$0xff] }
 0x1af   : > { %4005 = vmatpush1.bf16.msra.mxu1 %v4004_v58  ;;  %v4046_v58 = vpack.c.bf16 %v3421_v57, %v3419_v56  ;;  %v1683_v56 = vld [vmem:[%s6140_s7 + $0x78] sm:$0xff] }
 0x1b0   : > { %1524 = vmatprep.subr.mxu1 %v4474_v7 }
 0x1b3   : > { %1525 = vmatpush1.msra.mxu1 %v1476_v59  ;;  %v3424_v59 = vld [vmem:[%s6140_s7 + $0x118] sm:$0xff] }
 0x1b4   : > { %4006 = vmatprep.subr.bf16.mxu1 %v4476_v30 }
 0x255   : > { %v1356_v60 = vpop.f32.mrb[0].mxu1 }
 0x256   : > { %v1358_v61 = vpop.f32.mrb[1].mxu1 }
 0x259   : > { %v1362_v62 = vpop.f32.mrb[2].mxu1 }
 0x25a   : > { %v1364_v63 = vpop.f32.mrb[3].mxu1 }
 0x25d   : > { %v1441_v2 = vpop.f32.mrb[4].mxu1 }
 0x25e   : > { %v1452_v3 = vmax.f32 %v1356_v60, %v1441_v2  ;;  %v1443_v4 = vpop.f32.mrb[5].mxu1  ;;  %v3426_v60 = vld [vmem:[%s6140_s7 + $0x128] sm:$0xff] }
 0x25f   : > { %v1453_v5 = vmax.f32 %v1358_v61, %v1443_v4  ;;  %v4048_v61 = vpack.c.bf16 %v3426_v60, %v3424_v59  ;;  %v3430_v2 = vld [vmem:[%s6140_s7 + $0x148] sm:$0xff]  ;;  %v3427_v4 = vld [vmem:[%s6140_s7 + $0x130] sm:$0xff]  ;;  %v1680_v59 = vld [vmem:[%s6140_s7 + $0x60] sm:$0xff] }
 0x260   : > { %v1682_v60 = vld [vmem:[%s6140_s7 + $0x70] sm:$0xff] }
 0x261   : > { %v1447_v10 = vpop.f32.mrb[6].mxu1  ;;  %3406 = vmatprep.mubr.msk.f32.mxu1 %vm1477_vm5, %v1453_v5 }
 0x262   : > { %v1454_v11 = vmax.f32 %v1362_v62, %v1447_v10  ;;  %v1449_v12 = vpop.f32.mrb[7].mxu1  ;;  %1549 = vmatmul.mubr.f32.vlgmr.msra.gmra.mrb[8].mxu1 %v1452_v3  ;;  %v3423_v62 = vld [vmem:[%s6140_s7 + $0x110] sm:$0xff]  ;;  %v1669_v10 = vld [vmem:[%s6140_s7 + $0x8] sm:$0xff] }
 0x263   : > { %v1455_v13 = vmax.f32 %v1364_v63, %v1449_v12  ;;  %4008 = vmatpush1.bf16.msra.mxu1 %v4007_v6  ;;  %v3425_v63 = vld [vmem:[%s6140_s7 + $0x120] sm:$0xff] }
 0x264   : > { %4009 = vmatprep.subr.bf16.mxu1 %v4476_v30  ;;  %v4050_v0 = vpack.c.bf16 %v3425_v63, %v3423_v62  ;;  %v1687_v62 = vld [vmem:[%s6140_s7 + $0x98] sm:$0xff]  ;;  %v4070_v63 = vpack.c.bf16 %v1682_v60, %v1680_v59  ;;  %v3478_v59 = vld [vmem:[%s6140_s7 + $0x268] sm:$0xff] }
 0x265   : > { %3407 = vmatprep.mubr.msk.f32.mxu1 %vm1477_vm5, %v1455_v13 }
 0x266   : > { %1554 = vmatmul.mubr.f32.gmra.mrb[10].mxu1 %v1454_v11 }
 0x267   : > { %4011 = vmatpush1.bf16.msra.mxu1 %v4010_v14  ;;  %3408 = vmatprep.mubr.msk.f32.mxu1 %vm1477_vm5, %v1453_v5  ;;  %v3429_v5 = vld [vmem:[%s6140_s7 + $0x140] sm:$0xff] }
 0x268   : > { %4012 = vmatprep.subr.bf16.mxu1 %v4476_v30  ;;  %v4054_v6 = vpack.c.bf16 %v3429_v5, %v3427_v4  ;;  %v1689_v4 = vld [vmem:[%s6140_s7 + $0xa8] sm:$0xf] }
 0x269   : > { %v3442_v5 = vld [vmem:[%s6140_s7 + $0x168] sm:$0xff] }
 0x26b   : > { %4014 = vmatpush1.bf16.msra.mxu1 %v4013_v17 }
 0x26c   : > { %4015 = vmatprep.subr.bf16.mxu1 %v4476_v30 }
 0x26f   : > { %4017 = vmatpush1.bf16.msra.mxu1 %v4016_v20 }
 0x270   : > { %4018 = vmatprep.subr.bf16.mxu1 %v4476_v30 }
 0x273   : > { %4020 = vmatpush1.bf16.msra.mxu1 %v4019_v23 }
 0x274   : > { %4021 = vmatprep.subr.bf16.mxu1 %v4476_v30 }
 0x277   : > { %4023 = vmatpush1.bf16.msra.mxu1 %v4022_v26  ;;  %v1670_v26 = vld [vmem:[%s6140_s7 + $0x10] sm:$0xff] }
 0x278   : > { %4024 = vmatprep.subr.bf16.mxu1 %v4476_v30 }
 0x27b   : > { %4026 = vmatpush1.bf16.msra.mxu1 %v4025_v29  ;;  %v4058_v29 = vpack.c.bf16 %v1670_v26, %v1668_v25  ;;  %v3456_v25 = vld [vmem:[%s6140_s7 + $0x1d8] sm:$0xff] }
 0x27c   : > { %4027 = vmatprep.subr.bf16.mxu1 %v4476_v30 }
 0x27f   : > { %4029 = vmatpush1.bf16.msra.mxu1 %v4028_v33  ;;  %v1675_v33 = vld [vmem:[%s6140_s7 + $0x38] sm:$0xff] }
 0x280   : > { %4030 = vmatprep.subr.bf16.mxu1 %v4476_v30  ;;  %v4060_v42 = vpack.c.bf16 %v1675_v33, %v1673_v32  ;;  %v3458_v32 = vld [vmem:[%s6140_s7 + $0x1e8] sm:$0xff]  ;;  %v3460_v33 = vld [vmem:[%s6140_s7 + $0x1f8] sm:$0xff] }
 0x283   : > { %4032 = vmatpush1.bf16.msra.mxu1 %v4031_v36 }
 0x284   : > { %4033 = vmatprep.subr.bf16.mxu1 %v4476_v30 }
 0x287   : > { %4035 = vmatpush1.bf16.msra.mxu1 %v4034_v39 }
 0x288   : > { %1620 = vmatprep.subr.mxu1 %v4474_v7 }
 0x28b   : > { %1621 = vmatpush1.msra.mxu1 %v1579_v40 }
 0x28c   : > { %1645 = vmatmul.mubr.f32.vlgmr.msra.gmra.mrb[12].mxu1 %v1452_v3  ;;  %4037 = vmatprep.subr.bf16.mxu1 %v4036_v44  ;;  %v4052_v3 = vpack.c.bf16 %v3430_v2, %v3428_v1  ;;  %v1674_v44 = vld [vmem:[%s6140_s7 + $0x30] sm:$0xff]  ;;  %v1684_v1 = vld [vmem:[%s6140_s7 + $0x80] sm:$0xff] }
 0x28d   : > { %3409 = vmatprep.mubr.msk.f32.mxu1 %vm1477_vm5, %v1455_v13  ;;  %4039 = vmatpush1.bf16.msra.mxu1 %v4038_v48  ;;  %v4062_v51 = vpack.c.bf16 %v1674_v44, %v1672_v43  ;;  %v1686_v2 = vld [vmem:[%s6140_s7 + $0x90] sm:$0xff]  ;;  %v3468_v43 = vld [vmem:[%s6140_s7 + $0x218] sm:$0xff]  ;;  %v3470_v44 = vld [vmem:[%s6140_s7 + $0x228] sm:$0xff] }
 0x28e   : > { %4041 = vmatprep.subr.bf16.mxu1 %v4040_v49 }
 0x290   : > { %1650 = vmatmul.mubr.f32.gmra.mrb[14].mxu1 %v1454_v11  ;;  %v1671_v11 = vld [vmem:[%s6140_s7 + $0x18] sm:$0xff] }
 0x291   : > { %1794 = vmatprep.mubr.f32.mxu1 %v4474_v7  ;;  %4043 = vmatpush1.bf16.msra.mxu1 %v4042_v54  ;;  %v4056_v12 = vpack.c.bf16 %v1671_v11, %v1669_v10  ;;  %v1678_v54 = vld [vmem:[%s6140_s7 + $0x50] sm:$0xff]  ;;  %v3446_v10 = vld [vmem:[%s6140_s7 + $0x188] sm:$0xff]  ;;  %v3448_v11 = vld [vmem:[%s6140_s7 + $0x198] sm:$0xff] }
 0x292   : > { %4045 = vmatprep.subr.bf16.mxu1 %v4044_v55  ;;  %v1681_v55 = vld [vmem:[%s6140_s7 + $0x68] sm:$0xff]  ;;  %v4066_v57 = vpack.c.bf16 %v1678_v54, %v1676_v53  ;;  %v4096_v53 = vpack.c.bf16 %v3470_v44, %v3468_v43  ;;  %v3509_v44 = vld [vmem:[%s6140_s7 + $0x340] sm:$0xff] }
 0x295   : > { %4047 = vmatpush1.bf16.msra.mxu1 %v4046_v58  ;;  %v4068_v58 = vpack.c.bf16 %v1683_v56, %v1681_v55  ;;  %v3471_v56 = vld [vmem:[%s6140_s7 + $0x230] sm:$0xff] }
 0x296   : > { %4049 = vmatprep.subr.bf16.mxu1 %v4048_v61  ;;  %v1685_v61 = vld [vmem:[%s6140_s7 + $0x88] sm:$0xff] }
 0x299   : > { %4051 = vmatpush1.bf16.msra.mxu1 %v4050_v0  ;;  %v4072_v0 = vpack.c.bf16 %v1687_v62, %v1685_v61  ;;  %v3475_v62 = vld [vmem:[%s6140_s7 + $0x250] sm:$0xff] }
 0x29a   : > { %4053 = vmatprep.subr.bf16.mxu1 %v4052_v3  ;;  %v4074_v3 = vpack.c.bf16 %v1686_v2, %v1684_v1 }
 0x29d   : > { %4055 = vmatpush1.bf16.msra.mxu1 %v4054_v6  ;;  %v3444_v6 = vld [vmem:[%s6140_s7 + $0x178] sm:$0xff] }
 0x29e   : > { %3433 = vmatprep.subr.msk.mxu1 %vm1283_vm1, %v3432_v8  ;;  %v3441_v8 = vld [vmem:[%s6140_s7 + $0x160] sm:$0xff] }
 0x2a1   : > { %3434 = vmatpush1.msk.msra.mxu1 %vm1283_vm1, %v3431_v9  ;;  %v3443_v9 = vld [vmem:[%s6140_s7 + $0x170] sm:$0xff] }
 0x2a2   : > { %4057 = vmatprep.subr.bf16.mxu1 %v4056_v12  ;;  %v1688_v12 = vld [vmem:[%s6140_s7 + $0xa0] sm:$0xf] }
 0x335   : > { %v1550_v13 = vpop.f32.mrb[8].mxu1 }
 0x336   : > { %v1552_v14 = vpop.f32.mrb[9].mxu1 }
 0x337   : > { %v4078_v14 = vpack.c.bf16 %v3443_v9, %v3441_v8  ;;  %v3483_v9 = vld [vmem:[%s6140_s7 + $0x290] sm:$0xff] }
 0x339   : > { %v1555_v15 = vpop.f32.mrb[10].mxu1 }
 0x33a   : > { %v1557_v16 = vpop.f32.mrb[11].mxu1 }
 0x33b   : > { %v3445_v16 = vld [vmem:[%s6140_s7 + $0x180] sm:$0xff] }
 0x35f   : > { %v1646_v17 = vpop.f32.mrb[12].mxu1 }
 0x360   : > { %v1655_v19 = vmax.f32 %v1550_v13, %v1646_v17  ;;  %v1648_v20 = vpop.f32.mrb[13].mxu1  ;;  %v4076_v13 = vpack.c.bf16 %v3444_v6, %v3442_v5  ;;  %v3447_v17 = vld [vmem:[%s6140_s7 + $0x190] sm:$0xff]  ;;  %v3484_v5 = vld [vmem:[%s6140_s7 + $0x298] sm:$0xff] }
 0x361   : > { %v4082_v20 = vpack.c.bf16 %v3447_v17, %v3445_v16  ;;  %v3495_v16 = vld [vmem:[%s6140_s7 + $0x2d0] sm:$0xff]  ;;  %v3498_v17 = vld [vmem:[%s6140_s7 + $0x2e8] sm:$0xff] }
 0x362   : > { %v1664_v21 = vadd.f32 %v3410_v18, %v1655_v19  ;;  %v3452_v19 = vld [vmem:[%s6140_s7 + $0x1b8] sm:$0xff] }
 0x363   : > { %v1651_v22 = vpop.f32.mrb[14].mxu1 }
 0x364   : > { %v1656_v23 = vmax.f32 %v1555_v15, %v1651_v22  ;;  %v1653_v24 = vpop.f32.mrb[15].mxu1  ;;  %v5313_v27 = vmax.f32 %v1664_v21, 0.0  ;;  %v4080_v15 = vpack.c.bf16 %v3448_v11, %v3446_v10  ;;  %v3449_v22 = vld [vmem:[%s6140_s7 + $0x1a0] sm:$0xff] }
 0x365   : > { %v3454_v24 = vld [vmem:[%s6140_s7 + $0x1c8] sm:$0xff]  ;;  %v3485_v10 = vld [vmem:[%s6140_s7 + $0x2a0] sm:$0xff] }
 0x366   : > { %v1665_v28 = vadd.f32 %v3410_v18, %v1656_v23  ;;  %v1716_v34 = vrot.slane %v5313_v27, 1  ;;  %v1918_v35 = vrot.slane %v5313_v27, 2  ;;  %v2036_v36 = vrot.slane %v5313_v27, 3  ;;  %v3450_v18 = vld [vmem:[%s6140_s7 + $0x1a8] sm:$0xff]  ;;  %v3451_v23 = vld [vmem:[%s6140_s7 + $0x1b0] sm:$0xff] }
 0x367   : > { %v2153_v37 = vrot.slane %v5313_v27, 4  ;;  %v4084_v21 = vpack.c.bf16 %v3452_v19, %v3450_v18  ;;  %v4086_v26 = vpack.c.bf16 %v3451_v23, %v3449_v22  ;;  %v4114_v11 = vpack.c.bf16 %v3485_v10, %v3483_v9  ;;  %v3500_v18 = vld [vmem:[%s6140_s7 + $0x2f8] sm:$0xff]  ;;  %v3487_v19 = vld [vmem:[%s6140_s7 + $0x2b0] sm:$0xf]  ;;  %v3497_v23 = vld [vmem:[%s6140_s7 + $0x2e0] sm:$0xff] }
 0x368   : > { %v5315_v31 = vmax.f32 %v1665_v28, 0.0  ;;  %v3453_v28 = vld [vmem:[%s6140_s7 + $0x1c0] sm:$0xff]  ;;  %v4120_v22 = vpack.c.bf16 %v3500_v18, %v3498_v17  ;;  %v2424_v17 = vld [vmem:[%s6143_s10 + $0x88] sm:$0xff] }
 0x369   : > { %v2419_v10 = vld [vmem:[%s6143_s10 + $0x60] sm:$0xff] }
 0x36a   : > { %v1717_v38 = vrot.slane %v5315_v31, 1  ;;  %v1919_v39 = vrot.slane %v5315_v31, 2  ;;  %v2037_v40 = vrot.slane %v5315_v31, 3  ;;  %v2154_v41 = vrot.slane %v5315_v31, 4 }
 0x36c   : > { %v1718_v45 = vsel %vm1715_vm6, %v1716_v34, %v1717_v38  ;;  %v5347_v48 = vsel %vm1917_vm8, %v1918_v35, %v1919_v39  ;;  %v5352_v49 = vsel %vm2035_vm9, %v2036_v36, %v2037_v40  ;;  %v5357_v50 = vsel %vm1283_vm1, %v2153_v37, %v2154_v41  ;;  %v3457_v36 = vld [vmem:[%s6140_s7 + $0x1e0] sm:$0xff]  ;;  %v3459_v37 = vld [vmem:[%s6140_s7 + $0x1f0] sm:$0xff] }
 0x36d   : > { %3435 = vmatmul.mubr.msk.f32.vlgmr.msra.gmra.mrb[16].mxu1 %vm1719_vm7, %v1718_v45  ;;  %v4092_v35 = vpack.c.bf16 %v3460_v33, %v3458_v32  ;;  %v3467_v45 = vld [vmem:[%s6140_s7 + $0x210] sm:$0xff]  ;;  %v3506_v33 = vld [vmem:[%s6140_s7 + $0x328] sm:$0xff] }
 0x36e   : > { %4059 = vmatpush1.bf16.msra.mxu1 %v4058_v29  ;;  %1800 = vmatprep.mubr.f32.mxu1 %v4474_v7  ;;  %v3455_v29 = vld [vmem:[%s6140_s7 + $0x1d0] sm:$0xff]  ;;  %v4098_v54 = vpack.c.bf16 %v3469_v46, %v3467_v45 }
 0x36f   : > { %4061 = vmatprep.subr.bf16.mxu1 %v4060_v42  ;;  %v4090_v34 = vpack.c.bf16 %v3455_v29, %v3453_v28  ;;  %v3462_v42 = vld [vmem:[%s6140_s7 + $0x208] sm:$0xf]  ;;  %v3501_v29 = vld [vmem:[%s6140_s7 + $0x300] sm:$0xff]  ;;  %v3503_v32 = vld [vmem:[%s6140_s7 + $0x310] sm:$0xff] }
 0x370   : > { %v3511_v45 = vld [vmem:[%s6140_s7 + $0x350] sm:$0xff] }
 0x371   : > { %3436 = vmatmul.mubr.msk.f32.gmra.mrb[18].mxu1 %vm1719_vm7, %v1717_v38  ;;  %v4094_v38 = vpack.c.bf16 %v3459_v37, %v3457_v36  ;;  %v3505_v36 = vld [vmem:[%s6140_s7 + $0x320] sm:$0xff]  ;;  %v3507_v37 = vld [vmem:[%s6140_s7 + $0x330] sm:$0xff]  ;;  %v4134_v46 = vpack.c.bf16 %v3511_v45, %v3509_v44  ;;  %v2510_v44 = vld [vmem:[%s6144_s11 + $0x48] sm:$0xff] }
 0x372   : > { %4063 = vmatpush1.bf16.msra.mxu1 %v4062_v51  ;;  %1881 = vmatprep.mubr.f32.mxu1 %v4474_v7  ;;  %v3474_v51 = vld [vmem:[%s6140_s7 + $0x248] sm:$0xff] }
 0x373   : > { %4065 = vmatprep.subr.bf16.mxu1 %v4064_v52  ;;  %v3461_v52 = vld [vmem:[%s6140_s7 + $0x200] sm:$0xf]  ;;  %v4100_v55 = vpack.c.bf16 %v3474_v51, %v3472_v47  ;;  %v3514_v47 = vld [vmem:[%s6140_s7 + $0x368] sm:$0xf] }
 0x374   : > { %v3513_v51 = vld [vmem:[%s6140_s7 + $0x360] sm:$0xf] }
 0x376   : > { %4067 = vmatpush1.bf16.msra.mxu1 %v4066_v57  ;;  %v3473_v57 = vld [vmem:[%s6140_s7 + $0x240] sm:$0xff] }
 0x377   : > { %4069 = vmatprep.subr.bf16.mxu1 %v4068_v58  ;;  %v3476_v58 = vld [vmem:[%s6140_s7 + $0x258] sm:$0xff]  ;;  %v4102_v60 = vpack.c.bf16 %v3473_v57, %v3471_v56 }
 0x378   : > { %v4104_v61 = vpack.c.bf16 %v3478_v59, %v3476_v58  ;;  %v2330_v58 = vld [vmem:[%s6142_s9] sm:$0x1f] }
 0x37a   : > { %4071 = vmatpush1.bf16.msra.mxu1 %v4070_v63  ;;  %v3477_v63 = vld [vmem:[%s6140_s7 + $0x260] sm:$0xff] }
 0x37b   : > { %4073 = vmatprep.subr.bf16.mxu1 %v4072_v0  ;;  %v3480_v0 = vld [vmem:[%s6140_s7 + $0x278] sm:$0xff]  ;;  %v4106_v1 = vpack.c.bf16 %v3477_v63, %v3475_v62  ;;  %v2411_v63 = vld [vmem:[%s6143_s10 + $0x20] sm:$0xff] }
 0x37e   : > { %4075 = vmatpush1.bf16.msra.mxu1 %v4074_v3  ;;  %v3479_v3 = vld [vmem:[%s6140_s7 + $0x270] sm:$0xff] }
 0x37f   : > { %3437 = vmatprep.subr.msk.mxu1 %vm1283_vm1, %v1689_v4  ;;  %v3481_v4 = vld [vmem:[%s6140_s7 + $0x280] sm:$0xff] }
 0x380   : > { %v4110_v6 = vpack.c.bf16 %v3481_v4, %v3479_v3  ;;  %v2415_v4 = vld [vmem:[%s6143_s10 + $0x40] sm:$0xff] }
 0x382   : > { %3438 = vmatpush1.msk.msra.mxu1 %vm1283_vm1, %v1688_v12  ;;  %v3488_v12 = vld [vmem:[%s6140_s7 + $0x2b8] sm:$0xf] }
 0x383   : > { %3439 = vmatmul.mubr.msk.f32.vlgmr.msra.gmra.mrb[16].mxu1 %vm1719_vm7, %v5313_v27  ;;  %4077 = vmatprep.subr.bf16.mxu1 %v4076_v13  ;;  %v4088_v27 = vpack.c.bf16 %v3456_v25, %v3454_v24  ;;  %v3494_v13 = vld [vmem:[%s6140_s7 + $0x2c8] sm:$0xff]  ;;  %v3499_v24 = vld [vmem:[%s6140_s7 + $0x2f0] sm:$0xff] }
 0x384   : > { %4079 = vmatpush1.bf16.msra.mxu1 %v4078_v14  ;;  %1887 = vmatprep.mubr.f32.mxu1 %v4474_v7  ;;  %v3496_v14 = vld [vmem:[%s6140_s7 + $0x2d8] sm:$0xff]  ;;  %v3502_v25 = vld [vmem:[%s6140_s7 + $0x308] sm:$0xff] }
 0x385   : > { %4081 = vmatprep.subr.bf16.mxu1 %v4080_v15  ;;  %v3493_v15 = vld [vmem:[%s6140_s7 + $0x2c0] sm:$0xff] }
 0x387   : > { %3440 = vmatmul.mubr.msk.f32.gmra.mrb[18].mxu1 %vm1719_vm7, %v5315_v31  ;;  %v2407_v31 = vld [vmem:[%s6143_s10] sm:$0xff] }
 0x388   : > { %4083 = vmatpush1.bf16.msra.mxu1 %v4082_v20  ;;  %1995 = vmatprep.mubr.f32.mxu1 %v4474_v7  ;;  %v4116_v20 = vpack.c.bf16 %v3496_v14, %v3494_v13  ;;  %v2421_v13 = vld [vmem:[%s6143_s10 + $0x70] sm:$0xff]  ;;  %v2422_v14 = vld [vmem:[%s6143_s10 + $0x78] sm:$0xff] }
 0x389   : > { %4085 = vmatprep.subr.bf16.mxu1 %v4084_v21  ;;  %v4118_v21 = vpack.c.bf16 %v3495_v16, %v3493_v15  ;;  %v4170_v15 = vpack.c.bf16 %v2422_v14, %v2421_v13  ;;  %v2423_v16 = vld [vmem:[%s6143_s10 + $0x80] sm:$0xff]  ;;  %v2607_v14 = vld [vmem:[%s6146_s13 + $0x30] sm:$0xff] }
 0x38a   : > { %v4173_v18 = vpack.c.bf16 %v2424_v17, %v2423_v16  ;;  %v3534_v17 = vld [vmem:[%s6146_s13 + $0x80] sm:$0xff] }
 0x38c   : > { %4087 = vmatpush1.bf16.msra.mxu1 %v4086_v26  ;;  %v3504_v26 = vld [vmem:[%s6140_s7 + $0x318] sm:$0xff] }
 0x38d   : > { %4089 = vmatprep.subr.bf16.mxu1 %v4088_v27  ;;  %v4122_v27 = vpack.c.bf16 %v3499_v24, %v3497_v23  ;;  %v4124_v28 = vpack.c.bf16 %v3504_v26, %v3502_v25  ;;  %v2501_v24 = vld [vmem:[%s6144_s11] sm:$0xff]  ;;  %v2502_v25 = vld [vmem:[%s6144_s11 + $0x8] sm:$0xff] }
 0x390   : > { %4091 = vmatpush1.bf16.msra.mxu1 %v4090_v34  ;;  %v4126_v34 = vpack.c.bf16 %v3503_v32, %v3501_v29  ;;  %v4179_v32 = vpack.c.bf16 %v2502_v25, %v2501_v24  ;;  %v3537_v24 = vld [vmem:[%s6146_s13 + $0x98] sm:$0xff] }
 0x391   : > { %4093 = vmatprep.subr.bf16.mxu1 %v4092_v35 }
 0x394   : > { %4095 = vmatpush1.bf16.msra.mxu1 %v4094_v38  ;;  %v3510_v38 = vld [vmem:[%s6140_s7 + $0x348] sm:$0xff] }
 0x395   : > { %3463 = vmatprep.subr.msk.mxu1 %vm1283_vm1, %v3462_v42  ;;  %v4130_v42 = vpack.c.bf16 %v3507_v37, %v3505_v36  ;;  %v2506_v36 = vld [vmem:[%s6144_s11 + $0x28] sm:$0xff] }
 0x398   : > { %3464 = vmatpush1.msk.msra.mxu1 %vm1283_vm1, %v3461_v52 }
 0x399   : > { %3465 = vmatmul.mubr.msk.f32.vlgmr.msra.gmra.mrb[16].mxu1 %vm1719_vm7, %v5347_v48  ;;  %4097 = vmatprep.subr.bf16.mxu1 %v4096_v53  ;;  %v3482_v48 = vld [vmem:[%s6140_s7 + $0x288] sm:$0xff] }
 0x39a   : > { %4099 = vmatpush1.bf16.msra.mxu1 %v4098_v54  ;;  %2001 = vmatprep.mubr.f32.mxu1 %v4474_v7  ;;  %v4108_v2 = vpack.c.bf16 %v3482_v48, %v3480_v0  ;;  %v2412_v0 = vld [vmem:[%s6143_s10 + $0x28] sm:$0xff] }
 0x39b   : > { %4101 = vmatprep.subr.bf16.mxu1 %v4100_v55  ;;  %v4155_v48 = vpack.c.bf16 %v2412_v0, %v2411_v63  ;;  %v3528_v63 = vld [vmem:[%s6146_s13 + $0x50] sm:$0xff] }
 0x39d   : > { %3466 = vmatmul.mubr.msk.f32.gmra.mrb[18].mxu1 %vm1719_vm7, %v1919_v39  ;;  %v3486_v39 = vld [vmem:[%s6140_s7 + $0x2a8] sm:$0xff] }
 0x39e   : > { %4103 = vmatpush1.bf16.msra.mxu1 %v4102_v60  ;;  %2113 = vmatprep.mubr.f32.mxu1 %v4474_v7  ;;  %v4112_v8 = vpack.c.bf16 %v3486_v39, %v3484_v5  ;;  %v2409_v60 = vld [vmem:[%s6143_s10 + $0x10] sm:$0xff]  ;;  %v2416_v5 = vld [vmem:[%s6143_s10 + $0x48] sm:$0xff] }
 0x39f   : > { %4105 = vmatprep.subr.bf16.mxu1 %v4104_v61  ;;  %v2410_v61 = vld [vmem:[%s6143_s10 + $0x18] sm:$0xff]  ;;  %v4161_v39 = vpack.c.bf16 %v2416_v5, %v2415_v4  ;;  %v3530_v4 = vld [vmem:[%s6146_s13 + $0x60] sm:$0xff]  ;;  %v3531_v5 = vld [vmem:[%s6146_s13 + $0x68] sm:$0xff] }
 0x3a0   : > { %v4152_v62 = vpack.c.bf16 %v2410_v61, %v2409_v60  ;;  %v2601_v61 = vld [vmem:[%s6146_s13] sm:$0xff] }
 0x3a2   : > { %4107 = vmatpush1.bf16.msra.mxu1 %v4106_v1  ;;  %v2413_v1 = vld [vmem:[%s6143_s10 + $0x30] sm:$0xff] }
 0x3a3   : > { %4109 = vmatprep.subr.bf16.mxu1 %v4108_v2  ;;  %v2414_v2 = vld [vmem:[%s6143_s10 + $0x38] sm:$0xff] }
 0x3a4   : > { %v4158_v3 = vpack.c.bf16 %v2414_v2, %v2413_v1  ;;  %v2603_v1 = vld [vmem:[%s6146_s13 + $0x10] sm:$0xff]  ;;  %v2604_v2 = vld [vmem:[%s6146_s13 + $0x18] sm:$0xff] }
 0x3a6   : > { %4111 = vmatpush1.bf16.msra.mxu1 %v4110_v6  ;;  %v2417_v6 = vld [vmem:[%s6143_s10 + $0x50] sm:$0xff] }
 0x3a7   : > { %4113 = vmatprep.subr.bf16.mxu1 %v4112_v8  ;;  %v2418_v8 = vld [vmem:[%s6143_s10 + $0x58] sm:$0xff] }
 0x3a8   : > { %v4164_v9 = vpack.c.bf16 %v2418_v8, %v2417_v6  ;;  %v4212_v6 = vpack.c.bf16 %v3531_v5, %v3530_v4  ;;  %v2605_v8 = vld [vmem:[%s6146_s13 + $0x20] sm:$0xff]  ;;  %v3563_v4 = vld [vmem:[%s6146_s13 + $0x148] sm:$0xff] }
 0x3aa   : > { %4115 = vmatpush1.bf16.msra.mxu1 %v4114_v11  ;;  %v2420_v11 = vld [vmem:[%s6143_s10 + $0x68] sm:$0xff] }
 0x3ab   : > { %3489 = vmatprep.subr.msk.mxu1 %vm1283_vm1, %v3488_v12  ;;  %v4167_v12 = vpack.c.bf16 %v2420_v11, %v2419_v10  ;;  %v3532_v10 = vld [vmem:[%s6146_s13 + $0x70] sm:$0xff]  ;;  %v3533_v11 = vld [vmem:[%s6146_s13 + $0x78] sm:$0xff] }
 0x3ac   : > { %v4215_v13 = vpack.c.bf16 %v3533_v11, %v3532_v10  ;;  %v3566_v11 = vld [vmem:[%s6146_s13 + $0x160] sm:$0xff] }
 0x3ae   : > { %3490 = vmatpush1.msk.msra.mxu1 %vm1283_vm1, %v3487_v19  ;;  %v2425_v19 = vld [vmem:[%s6143_s10 + $0x90] sm:$0xff] }
 0x3af   : > { %3491 = vmatmul.mubr.msk.f32.vlgmr.msra.gmra.mrb[16].mxu1 %vm1719_vm7, %v5352_v49  ;;  %4117 = vmatprep.subr.bf16.mxu1 %v4116_v20  ;;  %v3508_v49 = vld [vmem:[%s6140_s7 + $0x338] sm:$0xff] }
 0x3b0   : > { %4119 = vmatpush1.bf16.msra.mxu1 %v4118_v21  ;;  %2119 = vmatprep.mubr.f32.mxu1 %v4474_v7  ;;  %v4128_v35 = vpack.c.bf16 %v3508_v49, %v3506_v33  ;;  %v2426_v20 = vld [vmem:[%s6143_s10 + $0x98] sm:$0xff]  ;;  %v2503_v33 = vld [vmem:[%s6144_s11 + $0x10] sm:$0xff] }
 0x3b1   : > { %4121 = vmatprep.subr.bf16.mxu1 %v4120_v22  ;;  %v4176_v21 = vpack.c.bf16 %v2426_v20, %v2425_v19  ;;  %v2504_v49 = vld [vmem:[%s6144_s11 + $0x18] sm:$0xff]  ;;  %v2609_v20 = vld [vmem:[%s6146_s13 + $0x40] sm:$0xff] }
 0x3b3   : > { %3492 = vmatmul.mubr.msk.f32.gmra.mrb[18].mxu1 %vm1719_vm7, %v2037_v40  ;;  %v3512_v40 = vld [vmem:[%s6140_s7 + $0x358] sm:$0xff] }
 0x3b4   : > { %4123 = vmatpush1.bf16.msra.mxu1 %v4122_v27  ;;  %2230 = vmatprep.mubr.f32.mxu1 %v4474_v7  ;;  %v4132_v43 = vpack.c.bf16 %v3512_v40, %v3510_v38  ;;  %v2507_v38 = vld [vmem:[%s6144_s11 + $0x30] sm:$0xff]  ;;  %v2508_v40 = vld [vmem:[%s6144_s11 + $0x38] sm:$0xff] }
 0x3b5   : > { %4125 = vmatprep.subr.bf16.mxu1 %v4124_v28 }
 0x3b8   : > { %4127 = vmatpush1.bf16.msra.mxu1 %v4126_v34  ;;  %v4182_v34 = vpack.c.bf16 %v2504_v49, %v2503_v33  ;;  %v3551_v49 = vld [vmem:[%s6146_s13 + $0xf0] sm:$0xff] }
 0x3b9   : > { %4129 = vmatprep.subr.bf16.mxu1 %v4128_v35  ;;  %v2505_v35 = vld [vmem:[%s6144_s11 + $0x20] sm:$0xff] }
 0x3ba   : > { %v4185_v37 = vpack.c.bf16 %v2506_v36, %v2505_v35  ;;  %v3540_v36 = vld [vmem:[%s6146_s13 + $0xa0] sm:$0xff] }
 0x3bc   : > { %4131 = vmatpush1.bf16.msra.mxu1 %v4130_v42  ;;  %v4188_v42 = vpack.c.bf16 %v2508_v40, %v2507_v38 }
 0x3bd   : > { %4133 = vmatprep.subr.bf16.mxu1 %v4132_v43  ;;  %v2509_v43 = vld [vmem:[%s6144_s11 + $0x40] sm:$0xff] }
 0x3be   : > { %v4191_v45 = vpack.c.bf16 %v2510_v44, %v2509_v43  ;;  %v3554_v43 = vld [vmem:[%s6146_s13 + $0x108] sm:$0xff] }
 0x3c0   : > { %4135 = vmatpush1.bf16.msra.mxu1 %v4134_v46  ;;  %v2511_v46 = vld [vmem:[%s6144_s11 + $0x50] sm:$0xff] }
 0x3c1   : > { %3515 = vmatprep.subr.msk.mxu1 %vm1283_vm1, %v3514_v47  ;;  %v2512_v47 = vld [vmem:[%s6144_s11 + $0x58] sm:$0xff] }
 0x3c4   : > { %3516 = vmatpush1.msk.msra.mxu1 %vm1283_vm1, %v3513_v51  ;;  %v4194_v51 = vpack.c.bf16 %v2512_v47, %v2511_v46  ;;  %v3542_v46 = vld [vmem:[%s6146_s13 + $0xb0] sm:$0xff]  ;;  %v3543_v47 = vld [vmem:[%s6146_s13 + $0xb8] sm:$0xff] }
 0x3c5   : > { %3517 = vmatmul.mubr.msk.f32.vlgmr.msra.gmra.mrb[16].mxu1 %vm1719_vm7, %v5357_v50  ;;  %4208 = vmatprep.subr.bf16.mxu1 %v4476_v30  ;;  %v2247_v50 = vld [vmem:[%s6141_s8] sm:$0x1f] }
 0x3c6   : > { %2236 = vmatprep.mubr.f32.mxu1 %v4474_v7 }
 0x3c9   : > { %3518 = vmatmul.mubr.msk.f32.gmra.mrb[18].mxu1 %vm1719_vm7, %v2154_v41  ;;  %v2408_v41 = vld [vmem:[%s6143_s10 + $0x8] sm:$0xff] }
 0x3ca   : > { %v4149_v59 = vpack.c.bf16 %v2408_v41, %v2407_v31  ;;  %v2518_v31 = vld [vmem:[%s6144_s11 + $0x88] sm:$0xff]  ;;  %3683 = vmatprep.mubr.msk.f32.mxu1 %vm4477_vm14, %v4474_v7 }
 0x498   : > { %v2232_v52 = vpop.f32.mrb[16].mxu1 }
 0x499   : > { %v2234_v53 = vpop.f32.mrb[17].mxu1 }
 0x49c   : > { %v2238_v54 = vpop.f32.mrb[18].mxu1 }
 0x49d   : > { %v4139_v55 = vpack.c.bf16 %v2238_v54, %v2232_v52  ;;  %v2240_v56 = vpop.f32.mrb[19].mxu1  ;;  %v2513_v52 = vld [vmem:[%s6144_s11 + $0x60] sm:$0xff] }
 0x49e   : > { %v4136_v57 = vpack.c.bf16 %v2240_v56, %v2234_v53  ;;  %v2514_v53 = vld [vmem:[%s6144_s11 + $0x68] sm:$0xff]  ;;  %v2516_v56 = vld [vmem:[%s6144_s11 + $0x78] sm:$0xff] }
 0x49f   : > { %v4197_v54 = vpack.c.bf16 %v2514_v53, %v2513_v52  ;;  %v3555_v52 = vld [vmem:[%s6146_s13 + $0x110] sm:$0xff]  ;;  %v3556_v53 = vld [vmem:[%s6146_s13 + $0x118] sm:$0xff] }
 0x4a0   : > { %4138 = vmatprep.subr.msk.bf16.mxu0 %vm4137_vm11, %v4136_v57 }
 0x4a1   : > { %4141 = vmatpush1.bf16.msk.msra.mxu0 %vm4137_vm11, %v4139_v55 }
 0x4a2   : > { %4144 = vmatprep.subr.msk.bf16.mxu0 %vm4137_vm11, %v4136_v57 }
 0x4a4   : > { %3521 = vmatmul.mubr.msk.f32.vlgmr.msra.gmra.mrb[8].mxu0 %vm2248_vm12, %v2247_v50  ;;  %v2517_v50 = vld [vmem:[%s6144_s11 + $0x80] sm:$0xff] }
 0x4a5   : > { %4147 = vmatpush1.bf16.msk.msra.mxu0 %vm4137_vm11, %v4139_v55  ;;  %2398 = vmatprep.mubr.f32.mxu0 %v4474_v7  ;;  %v2515_v55 = vld [vmem:[%s6144_s11 + $0x70] sm:$0xff]  ;;  %v4203_v41 = vpack.c.bf16 %v2518_v31, %v2517_v50  ;;  %v3557_v50 = vld [vmem:[%s6146_s13 + $0x120] sm:$0xff]  ;;  %v3558_v31 = vld [vmem:[%s6146_s13 + $0x128] sm:$0xff] }
 0x4a6   : > { %4148 = vmatprep.subr.bf16.mxu0 %v4476_v30  ;;  %v4200_v57 = vpack.c.bf16 %v2516_v56, %v2515_v55  ;;  %v3544_v55 = vld [vmem:[%s6146_s13 + $0xc0] sm:$0xff]  ;;  %v3545_v56 = vld [vmem:[%s6146_s13 + $0xc8] sm:$0xff] }
 0x4a8   : > { %3524 = vmatmul.mubr.msk.f32.vlgmr.msra.gmra.mrb[10].mxu0 %vm2248_vm12, %v2330_v58  ;;  %v2519_v58 = vld [vmem:[%s6144_s11 + $0x90] sm:$0xff] }
 0x4a9   : > { %4150 = vmatpush1.bf16.msra.mxu0 %v4149_v59  ;;  %v2520_v59 = vld [vmem:[%s6144_s11 + $0x98] sm:$0xff] }
 0x4aa   : > { %4151 = vmatprep.subr.bf16.mxu0 %v4476_v30  ;;  %v4206_v60 = vpack.c.bf16 %v2520_v59, %v2519_v58  ;;  %v3546_v58 = vld [vmem:[%s6146_s13 + $0xd0] sm:$0xff]  ;;  %v3547_v59 = vld [vmem:[%s6146_s13 + $0xd8] sm:$0xff] }
 0x4ad   : > { %4153 = vmatpush1.bf16.msra.mxu0 %v4152_v62  ;;  %v2602_v62 = vld [vmem:[%s6146_s13 + $0x8] sm:$0xff] }
 0x4ae   : > { %4154 = vmatprep.subr.bf16.mxu0 %v4476_v30  ;;  %v4224_v0 = vpack.c.bf16 %v2602_v62, %v2601_v61  ;;  %v3559_v61 = vld [vmem:[%s6146_s13 + $0x130] sm:$0xff]  ;;  %v3560_v62 = vld [vmem:[%s6146_s13 + $0x138] sm:$0xff] }
 0x4b1   : > { %4156 = vmatpush1.bf16.msra.mxu0 %v4155_v48  ;;  %v3529_v48 = vld [vmem:[%s6146_s13 + $0x58] sm:$0xff] }
 0x4b2   : > { %4157 = vmatprep.subr.bf16.mxu0 %v4476_v30 }
 0x4b5   : > { %4159 = vmatpush1.bf16.msra.mxu0 %v4158_v3  ;;  %v4209_v3 = vpack.c.bf16 %v3529_v48, %v3528_v63  ;;  %v4248_v63 = vpack.c.bf16 %v3547_v59, %v3546_v58  ;;  %v3549_v48 = vld [vmem:[%s6146_s13 + $0xe8] sm:$0xff] }
 0x4b6   : > { %4160 = vmatprep.subr.bf16.mxu0 %v4476_v30 }
 0x4b7   : > { %4210 = vmatpush3.bf16.msra.mxu1 %v4209_v3  ;;  %v3562_v3 = vld [vmem:[%s6146_s13 + $0x140] sm:$0xff] }
 0x4b8   : > { %4211 = vmatprep.subr.bf16.mxu1 %v4476_v30 }
 0x4b9   : > { %4162 = vmatpush1.bf16.msra.mxu0 %v4161_v39  ;;  %v4227_v39 = vpack.c.bf16 %v2604_v2, %v2603_v1  ;;  %v4266_v1 = vpack.c.bf16 %v3560_v62, %v3559_v61 }
 0x4ba   : > { %4163 = vmatprep.subr.bf16.mxu0 %v4476_v30 }
 0x4bb   : > { %4213 = vmatpush3.bf16.msra.mxu1 %v4212_v6 }
 0x4bc   : > { %4214 = vmatprep.subr.bf16.mxu1 %v4476_v30 }
 0x4bd   : > { %4165 = vmatpush1.bf16.msra.mxu0 %v4164_v9  ;;  %v2606_v9 = vld [vmem:[%s6146_s13 + $0x28] sm:$0xff] }
 0x4be   : > { %4166 = vmatprep.subr.bf16.mxu0 %v4476_v30 }
 0x4bf   : > { %4216 = vmatpush3.bf16.msra.mxu1 %v4215_v13 }
 0x4c0   : > { %4217 = vmatprep.subr.bf16.mxu1 %v4476_v30 }
 0x4c1   : > { %4168 = vmatpush1.bf16.msra.mxu0 %v4167_v12  ;;  %v4230_v12 = vpack.c.bf16 %v2606_v9, %v2605_v8  ;;  %v3564_v8 = vld [vmem:[%s6146_s13 + $0x150] sm:$0xff]  ;;  %v3565_v9 = vld [vmem:[%s6146_s13 + $0x158] sm:$0xff] }
 0x4c2   : > { %4169 = vmatprep.subr.bf16.mxu0 %v4476_v30  ;;  %v4272_v10 = vpack.c.bf16 %v3565_v9, %v3564_v8  ;;  %v3126_v9 = vld [vmem:[%s6150_s17 + $0x40] sm:$0xff] }
 0x4c5   : > { %4171 = vmatpush1.bf16.msra.mxu0 %v4170_v15  ;;  %v2608_v15 = vld [vmem:[%s6146_s13 + $0x38] sm:$0xff] }
 0x4c6   : > { %4172 = vmatprep.subr.bf16.mxu0 %v4476_v30  ;;  %v4233_v16 = vpack.c.bf16 %v2608_v15, %v2607_v14  ;;  %v3568_v14 = vld [vmem:[%s6146_s13 + $0x170] sm:$0xff]  ;;  %v3569_v15 = vld [vmem:[%s6146_s13 + $0x178] sm:$0xff] }
 0x4c9   : > { %4174 = vmatpush1.bf16.msra.mxu0 %v4173_v18  ;;  %v3535_v18 = vld [vmem:[%s6146_s13 + $0x88] sm:$0xff] }
 0x4ca   : > { %4175 = vmatprep.subr.bf16.mxu0 %v4476_v30  ;;  %v4218_v19 = vpack.c.bf16 %v3535_v18, %v3534_v17  ;;  %v3570_v17 = vld [vmem:[%s6146_s13 + $0x180] sm:$0xff]  ;;  %v3571_v18 = vld [vmem:[%s6146_s13 + $0x188] sm:$0xff] }
 0x4cc   : > { %4219 = vmatpush3.bf16.msra.mxu1 %v4218_v19  ;;  %v4281_v19 = vpack.c.bf16 %v3571_v18, %v3570_v17 }
 0x4cd   : > { %4177 = vmatpush1.bf16.msra.mxu0 %v4176_v21  ;;  %v2610_v21 = vld [vmem:[%s6146_s13 + $0x48] sm:$0xff]  ;;  %4220 = vmatprep.subr.bf16.mxu1 %v4476_v30 }
 0x4ce   : > { %4178 = vmatprep.subr.bf16.mxu0 %v4476_v30 }
 0x577   : > { %v2325_v22 = vpop.f32.mrb[8].mxu0 }
 0x578   : > { %v2327_v23 = vpop.f32.mrb[9].mxu0 }
 0x57b   : > { %v2400_v26 = vpop.f32.mrb[10].mxu0 }
 0x57c   : > { %v2405_v27 = vmax.f32 %v2325_v22, %v2400_v26  ;;  %v2402_v28 = vpop.f32.mrb[11].mxu0  ;;  %v4236_v22 = vpack.c.bf16 %v2610_v21, %v2609_v20  ;;  %v3027_v21 = vld [vmem:[%s6148_s15] sm:$0xff] }
 0x57d   : > { %v2406_v29 = vmax.f32 %v2327_v23, %v2402_v28  ;;  %v3536_v23 = vld [vmem:[%s6146_s13 + $0x90] sm:$0xff] }
 0x57e   : > { %v4221_v25 = vpack.c.bf16 %v3537_v24, %v3536_v23  ;;  %v3029_v24 = vld [vmem:[%s6148_s15 + $0x10] sm:$0xff] }
 0x57f   : > { %3525 = vmatprep.mubr.msk.f32.mxu0 %vm2427_vm13, %v2406_v29 }
 0x580   : > { %2496 = vmatmul.mubr.f32.vlgmr.msra.gmra.mrb[12].mxu0 %v2405_v27  ;;  %4222 = vmatpush3.bf16.msra.mxu1 %v4221_v25  ;;  %v3030_v25 = vld [vmem:[%s6148_s15 + $0x18] sm:$0xff] }
 0x581   : > { %4180 = vmatpush1.bf16.msra.mxu0 %v4179_v32  ;;  %3526 = vmatprep.mubr.msk.f32.mxu0 %vm2427_vm13, %v2406_v29  ;;  %v3527_v29 = vld [vmem:[%s6145_s12] ss:$0 sm:$0xff] }
 0x582   : > { %4181 = vmatprep.subr.bf16.mxu0 %v4476_v30  ;;  %4238 = vmatprep.subr.bf16.mxu1 %v4476_v30 }
 0x585   : > { %4183 = vmatpush1.bf16.msra.mxu0 %v4182_v34  ;;  %v3552_v34 = vld [vmem:[%s6146_s13 + $0xf8] sm:$0xff] }
 0x586   : > { %4184 = vmatprep.subr.bf16.mxu0 %v4476_v30  ;;  %v4254_v38 = vpack.c.bf16 %v3552_v34, %v3551_v49  ;;  %v3035_v34 = vld [vmem:[%s6148_s15 + $0x40] sm:$0xff] }
 0x589   : > { %4186 = vmatpush1.bf16.msra.mxu0 %v4185_v37  ;;  %v3541_v37 = vld [vmem:[%s6146_s13 + $0xa8] sm:$0xff] }
 0x58a   : > { %4187 = vmatprep.subr.bf16.mxu0 %v4476_v30  ;;  %v4239_v44 = vpack.c.bf16 %v3541_v37, %v3540_v36  ;;  %v3037_v37 = vld [vmem:[%s6148_s15 + $0x50] sm:$0xff] }
 0x58d   : > { %4189 = vmatpush1.bf16.msra.mxu0 %v4188_v42  ;;  %v3553_v42 = vld [vmem:[%s6146_s13 + $0x100] sm:$0xff] }
 0x58e   : > { %4190 = vmatprep.subr.bf16.mxu0 %v4476_v30 }
 0x591   : > { %4192 = vmatpush1.bf16.msra.mxu0 %v4191_v45 }
 0x592   : > { %4193 = vmatprep.subr.bf16.mxu0 %v4476_v30 }
 0x595   : > { %4195 = vmatpush1.bf16.msra.mxu0 %v4194_v51  ;;  %v4257_v51 = vpack.c.bf16 %v3554_v43, %v3553_v42  ;;  %v3039_v42 = vld [vmem:[%s6148_s15 + $0x60] sm:$0xff]  ;;  %v3040_v43 = vld [vmem:[%s6148_s15 + $0x68] sm:$0xff] }
 0x596   : > { %4196 = vmatprep.subr.bf16.mxu0 %v4476_v30 }
 0x599   : > { %4198 = vmatpush1.bf16.msra.mxu0 %v4197_v54  ;;  %v4242_v54 = vpack.c.bf16 %v3543_v47, %v3542_v46  ;;  %v3118_v46 = vld [vmem:[%s6150_s17] sm:$0xff]  ;;  %v3119_v47 = vld [vmem:[%s6150_s17 + $0x8] sm:$0xff] }
 0x59a   : > { %4199 = vmatprep.subr.bf16.mxu0 %v4476_v30 }
 0x59d   : > { %4201 = vmatpush1.bf16.msra.mxu0 %v4200_v57  ;;  %v4260_v57 = vpack.c.bf16 %v3556_v53, %v3555_v52  ;;  %v4305_v52 = vpack.c.bf16 %v3119_v47, %v3118_v46  ;;  %v3121_v53 = vld [vmem:[%s6150_s17 + $0x18] sm:$0xff] }
 0x59e   : > { %4202 = vmatprep.subr.bf16.mxu0 %v4476_v30 }
 0x5a1   : > { %4204 = vmatpush1.bf16.msra.mxu0 %v4203_v41  ;;  %v4245_v41 = vpack.c.bf16 %v3545_v56, %v3544_v55  ;;  %v3122_v55 = vld [vmem:[%s6150_s17 + $0x20] sm:$0xff]  ;;  %v3123_v56 = vld [vmem:[%s6150_s17 + $0x28] sm:$0xff] }
 0x5a2   : > { %4205 = vmatprep.subr.bf16.mxu0 %v4476_v30 }
 0x5a5   : > { %4207 = vmatpush1.bf16.msra.mxu0 %v4206_v60  ;;  %v4263_v60 = vpack.c.bf16 %v3558_v31, %v3557_v50  ;;  %v3124_v50 = vld [vmem:[%s6150_s17 + $0x30] sm:$0xff]  ;;  %v3125_v31 = vld [vmem:[%s6150_s17 + $0x38] sm:$0xff] }
 0x5a6   : > { %4223 = vmatprep.subr.bf16.mxu0 %v4476_v30 }
 0x5a8   : > { %2586 = vmatmul.mubr.f32.vlgmr.msra.gmra.mrb[14].mxu0 %v2405_v27 }
 0x5a9   : > { %4225 = vmatpush3.bf16.msra.mxu0 %v4224_v0  ;;  %3706 = vmatprep.mubr.msk.f32.mxu0 %vm4477_vm14, %v4474_v7  ;;  %v3548_v0 = vld [vmem:[%s6146_s13 + $0xe0] sm:$0xff] }
 0x5aa   : > { %4226 = vmatprep.subr.bf16.mxu0 %v4476_v30  ;;  %v4251_v2 = vpack.c.bf16 %v3549_v48, %v3548_v0 }
 0x5ad   : > { %4228 = vmatpush3.bf16.msra.mxu0 %v4227_v39  ;;  %v4269_v39 = vpack.c.bf16 %v3563_v4, %v3562_v3 }
 0x5ae   : > { %4229 = vmatprep.subr.bf16.mxu0 %v4476_v30 }
 0x5b1   : > { %4231 = vmatpush3.bf16.msra.mxu0 %v4230_v12  ;;  %v3567_v12 = vld [vmem:[%s6146_s13 + $0x168] sm:$0xff] }
 0x5b2   : > { %4232 = vmatprep.subr.bf16.mxu0 %v4476_v30  ;;  %v4275_v13 = vpack.c.bf16 %v3567_v12, %v3566_v11  ;;  %v3128_v12 = vld [vmem:[%s6150_s17 + $0x50] sm:$0xf] }
 0x5b5   : > { %4234 = vmatpush3.bf16.msra.mxu0 %v4233_v16  ;;  %v4278_v16 = vpack.c.bf16 %v3569_v15, %v3568_v14 }
 0x5b6   : > { %4235 = vmatprep.subr.bf16.mxu0 %v4476_v30 }
 0x5b9   : > { %4237 = vmatpush3.bf16.msra.mxu0 %v4236_v22  ;;  %v3028_v22 = vld [vmem:[%s6148_s15 + $0x8] sm:$0xff] }
 0x5ba   : > { %4253 = vmatprep.subr.bf16.mxu0 %v4476_v30  ;;  %v4284_v23 = vpack.c.bf16 %v3028_v22, %v3027_v21 }
 0x653   : > { %v2497_v26 = vpop.f32.mrb[12].mxu0 }
 0x654   : > { %v2499_v27 = vpop.f32.mrb[13].mxu0 }
 0x655   : > { %v3031_v27 = vld [vmem:[%s6148_s15 + $0x20] sm:$0xff] }
 0x67b   : > { %v2587_v28 = vpop.f32.mrb[14].mxu0 }
 0x67c   : > { %v2591_v32 = vmax.f32 %v2497_v26, %v2587_v28  ;;  %v2589_v33 = vpop.f32.mrb[15].mxu0  ;;  %v4287_v26 = vpack.c.bf16 %v3030_v25, %v3029_v24  ;;  %v3032_v28 = vld [vmem:[%s6148_s15 + $0x28] sm:$0xff] }
 0x67d   : > { %v3034_v33 = vld [vmem:[%s6148_s15 + $0x38] sm:$0xff] }
 0x67e   : > { %v2599_v35 = vadd.f32 %v3527_v29, %v2591_v32  ;;  %v4290_v29 = vpack.c.bf16 %v3032_v28, %v3031_v27  ;;  %v3033_v32 = vld [vmem:[%s6148_s15 + $0x30] sm:$0xff] }
 0x67f   : > { %v4293_v49 = vpack.c.bf16 %v3034_v33, %v3033_v32 }
 0x680   : > { %v5870_v40 = vmax.f32 %v2599_v35, 0.0  ;;  %v3036_v35 = vld [vmem:[%s6148_s15 + $0x48] sm:$0xff] }
 0x681   : > { %v4296_v36 = vpack.c.bf16 %v3036_v35, %v3035_v34 }
 0x682   : > { %v2623_v45 = vrot.slane %v5870_v40, 1  ;;  %3707 = vmatmul.mubr.msk.f32.vlgmr.msra.gmra.mrb[16].mxu0 %vm2624_vm15, %v5870_v40  ;;  %v2865_v5 = vrot.slane %v5870_v40, 3  ;;  %v2780_v6 = vrot.slane %v5870_v40, 2  ;;  %v2950_v20 = vrot.slane %v5870_v40, 4 }
 0x683   : > { %4255 = vmatpush3.bf16.msra.mxu0 %v4254_v38  ;;  %3752 = vmatprep.mubr.msk.f32.mxu0 %vm4477_vm14, %v4474_v7  ;;  %v3038_v38 = vld [vmem:[%s6148_s15 + $0x58] sm:$0xff] }
 0x684   : > { %3684 = vmatmul.mubr.msk.f32.vlgmr.msra.gmra.mrb[20].mxu1 %vm2624_vm15, %v2623_v45  ;;  %4256 = vmatprep.subr.bf16.mxu0 %v4476_v30  ;;  %v4299_v40 = vpack.c.bf16 %v3038_v38, %v3037_v37  ;;  %v3041_v45 = vld [vmem:[%s6148_s15 + $0x70] sm:$0xff] }
 0x685   : > { %4240 = vmatpush3.bf16.msra.mxu1 %v4239_v44  ;;  %3729 = vmatprep.mubr.msk.f32.mxu1 %vm4477_vm14, %v4474_v7  ;;  %v4302_v44 = vpack.c.bf16 %v3040_v43, %v3039_v42 }
 0x686   : > { %4241 = vmatprep.subr.bf16.mxu1 %v4476_v30 }
 0x687   : > { %4258 = vmatpush3.bf16.msra.mxu0 %v4257_v51  ;;  %v3120_v51 = vld [vmem:[%s6150_s17 + $0x10] sm:$0xff] }
 0x688   : > { %4259 = vmatprep.subr.bf16.mxu0 %v4476_v30 }
 0x689   : > { %4243 = vmatpush3.bf16.msra.mxu1 %v4242_v54  ;;  %v4308_v54 = vpack.c.bf16 %v3121_v53, %v3120_v51 }
 0x68a   : > { %4244 = vmatprep.subr.bf16.mxu1 %v4476_v30 }
 0x68b   : > { %4261 = vmatpush3.bf16.msra.mxu0 %v4260_v57  ;;  %v4311_v57 = vpack.c.bf16 %v3123_v56, %v3122_v55 }
 0x68c   : > { %4262 = vmatprep.subr.bf16.mxu0 %v4476_v30 }
 0x68d   : > { %4246 = vmatpush3.bf16.msra.mxu1 %v4245_v41  ;;  %v4314_v41 = vpack.c.bf16 %v3125_v31, %v3124_v50 }
 0x68e   : > { %4247 = vmatprep.subr.bf16.mxu1 %v4476_v30 }
 0x68f   : > { %4264 = vmatpush3.bf16.msra.mxu0 %v4263_v60 }
 0x690   : > { %4265 = vmatprep.subr.bf16.mxu0 %v4476_v30 }
 0x691   : > { %4249 = vmatpush3.bf16.msra.mxu1 %v4248_v63 }
 0x692   : > { %4250 = vmatprep.subr.bf16.mxu1 %v4476_v30 }
 0x693   : > { %4267 = vmatpush3.bf16.msra.mxu0 %v4266_v1 }
 0x694   : > { %4283 = vmatprep.subr.bf16.mxu0 %v4476_v30 }
 0x695   : > { %4252 = vmatpush3.bf16.msra.mxu1 %v4251_v2 }
 0x696   : > { %3753 = vmatmul.mubr.msk.f32.vlgmr.msra.gmra.mrb[18].mxu0 %vm2624_vm15, %v2865_v5  ;;  %4268 = vmatprep.subr.bf16.mxu1 %v4476_v30  ;;  %v3024_v5 = vld [vmem:[%s6147_s14] sm:$0x1] }
 0x697   : > { %3808 = vmatprep.mubr.msk.f32.mxu0 %vm4477_vm14, %v4474_v7  ;;  %4285 = vmatpush3.bf16.msra.mxu0 %v4284_v23 }
 0x698   : > { %3730 = vmatmul.mubr.msk.f32.vlgmr.msra.gmra.mrb[22].mxu1 %vm2624_vm15, %v2780_v6  ;;  %4286 = vmatprep.subr.bf16.mxu0 %v4476_v30 }
 0x699   : > { %4270 = vmatpush3.bf16.msra.mxu1 %v4269_v39  ;;  %3775 = vmatprep.mubr.msk.f32.mxu1 %vm4477_vm14, %v4474_v7 }
 0x69a   : > { %4271 = vmatprep.subr.bf16.mxu1 %v4476_v30 }
 0x69b   : > { %4288 = vmatpush3.bf16.msra.mxu0 %v4287_v26 }
 0x69c   : > { %4289 = vmatprep.subr.bf16.mxu0 %v4476_v30 }
 0x69d   : > { %4273 = vmatpush3.bf16.msra.mxu1 %v4272_v10  ;;  %v3127_v10 = vld [vmem:[%s6150_s17 + $0x48] sm:$0xff] }
 0x69e   : > { %4274 = vmatprep.subr.bf16.mxu1 %v4476_v30  ;;  %v4317_v11 = vpack.c.bf16 %v3127_v10, %v3126_v9 }
 0x69f   : > { %4291 = vmatpush3.bf16.msra.mxu0 %v4290_v29 }
 0x6a0   : > { %4292 = vmatprep.subr.bf16.mxu0 %v4476_v30 }
 0x6a1   : > { %4276 = vmatpush3.bf16.msra.mxu1 %v4275_v13  ;;  %v3042_v13 = vld [vmem:[%s6149_s16] sm:$0x1] }
 0x6a2   : > { %4277 = vmatprep.subr.bf16.mxu1 %v4476_v30 }
 0x6a3   : > { %4294 = vmatpush3.bf16.msra.mxu0 %v4293_v49 }
 0x6a4   : > { %4295 = vmatprep.subr.bf16.mxu0 %v4476_v30 }
 0x6a5   : > { %4279 = vmatpush3.bf16.msra.mxu1 %v4278_v16 }
 0x6a6   : > { %4280 = vmatprep.subr.bf16.mxu1 %v4476_v30 }
 0x6a7   : > { %4297 = vmatpush3.bf16.msra.mxu0 %v4296_v36 }
 0x6a8   : > { %4298 = vmatprep.subr.bf16.mxu0 %v4476_v30 }
 0x6a9   : > { %4282 = vmatpush3.bf16.msra.mxu1 %v4281_v19 }
 0x6aa   : > { %4304 = vmatprep.subr.bf16.mxu1 %v4476_v30 }
 0x6ab   : > { %4300 = vmatpush3.bf16.msra.mxu0 %v4299_v40 }
 0x6ac   : > { %3776 = vmatmul.mubr.msk.f32.vlgmr.msra.gmra.mrb[24].mxu1 %vm2624_vm15, %v2950_v20  ;;  %4301 = vmatprep.subr.bf16.mxu0 %v4476_v30 }
 0x6ad   : > { %3833 = vmatprep.mubr.msk.f32.mxu1 %vm4477_vm14, %v4474_v7  ;;  %4306 = vmatpush3.bf16.msra.mxu1 %v4305_v52 }
 0x6ae   : > { %4307 = vmatprep.subr.bf16.mxu1 %v4476_v30 }
 0x6af   : > { %4303 = vmatpush3.bf16.msra.mxu0 %v4302_v44 }
 0x6b0   : > { %3806 = vmatprep.subr.mxu0 %v4474_v7 }
 0x6b1   : > { %4309 = vmatpush3.bf16.msra.mxu1 %v4308_v54 }
 0x6b2   : > { %4310 = vmatprep.subr.bf16.mxu1 %v4476_v30 }
 0x6b3   : > { %3807 = vmatpush3.msra.mxu0 %v3041_v45 }
 0x6b5   : > { %4312 = vmatpush3.bf16.msra.mxu1 %v4311_v57 }
 0x6b6   : > { %4313 = vmatprep.subr.bf16.mxu1 %v4476_v30 }
 0x6b9   : > { %4315 = vmatpush3.bf16.msra.mxu1 %v4314_v41 }
 0x6ba   : > { %4316 = vmatprep.subr.bf16.mxu1 %v4476_v30 }
 0x6bd   : > { %4318 = vmatpush3.bf16.msra.mxu1 %v4317_v11 }
 0x6be   : > { %3831 = vmatprep.subr.mxu1 %v4474_v7  ;;  %v3129_v7 = vld [vmem:[%s6185_s21] sm:$0x1]  ;;  %s4414_s21 = sshll.u32 %s4478_s1, 4  ;;  %s4415_s21 = int_to_ptr.vmem [resolvable:$false] %s4414_s21 }
 0x6bf   : > { %s4416_s5 = scalar_lea.vmem %s4415_s21, 32  ;;  %p4417_p0 = scmp.lt.s32.totalorder %s6093_s22, %s4415_s21 }
 0x6c0   : > { %p4418_p1 = scmp.lt.s32.totalorder %s4416_s5, %s4410_s26 }
 0x6c1   : > { %3832 = vmatpush3.msk.msra.mxu1 %vm1283_vm1, %v3128_v12  ;;  %vm3206_vm1 = vcmask 73728  }
 0x6c2   : > { %p4419_p2 = por %p4418_p1, %p4417_p0 }
 0x6c4   : > { %p4420_p3 = pnand %p4419_p2, %p4413_p13 }
 0x755   : > { %v2765_v58 = vpop.f32.mrb[16].mxu0 }
 0x756   : > { %v3708_v59 = vpop.f32.mrb[17].mxu0 }
 0x757   : > { %v2693_v60 = vpop.f32.mrb[20].mxu1 }
 0x758   : > { %v2766_v61 = vadd.f32 %v2765_v58, %v2693_v60  ;;  %v3685_v62 = vpop.f32.mrb[21].mxu1 }
 0x769   : > { %v2934_v63 = vpop.f32.mrb[18].mxu0 }
 0x76a   : > { %v3754_v0 = vpop.f32.mrb[19].mxu0 }
 0x76b   : > { %v2849_v48 = vpop.f32.mrb[22].mxu1 }
 0x76c   : > { %v2853_v1 = vadd.f32 %v2849_v48, %v2766_v61  ;;  %v3731_v2 = vpop.f32.mrb[23].mxu1 }
 0x76e   : > { %v2938_v3 = vadd.f32 %v2934_v63, %v2853_v1 }
 0x77f   : > { %v3019_v4 = vpop.f32.mrb[24].mxu1 }
 0x780   : > { %v3023_v39 = vadd.f32 %v3019_v4, %v2938_v3  ;;  %v3777_v6 = vpop.f32.mrb[25].mxu1 }
 0x782   : > { %v3025_v8 = vadd.f32 %v3024_v5, %v3023_v39 }
 0x784   : > { %v3026_v30 = vmax.f32 %v3025_v8, 0.0 }
 0x786   : > { %3809 = vmatmul.mubr.msk.f32.vlgmr.msra.gmra.mrb[20].mxu0 %vm3043_vm0, %v3026_v30 }
 0x859   : > { %v3113_v14 = vpop.f32.mrb[20].mxu0 }
 0x85a   : > { %v3114_v15 = vadd.f32 %v3113_v14, %v3042_v13  ;;  %v3810_v16 = vpop.f32.mrb[21].mxu0 }
 0x85c   : > { %v3117_v17 = vmax.f32 %v3114_v15, 0.0 }
 0x85e   : > { %3834 = vmatmul.mubr.msk.f32.vlgmr.msra.gmra.mrb[26].mxu1 %vm1719_vm7, %v3117_v17 }
 0x931   : > { %v3202_v18 = vpop.f32.mrb[26].mxu1 }
 0x932   : > { %v3203_v19 = vadd.f32 %v3202_v18, %v3129_v7  ;;  %v3835_v20 = vpop.f32.mrb[27].mxu1 }
 0x934   : > { %3207 = vst.msk [vmem:[%s594_s19] sm:$0x1] %vm3206_vm1, %v3203_v19 }
 0x935   : > { %4423 = shalt.err (!%p4420_p3)
}
 0x936   : > { %s4424_s18 = scalar_lea.hbm %s6091_s4, 16  ;;  %s4428_s25 = scalar_lea.hbm %s6187_s2, 32 }
 0x937   : > { %p4425_p4 = scmp.ne.s32.totalorder %s6091_s4, %s4424_s18  ;;  %p4429_p9 = scmp.lt.u32.totalorder %s6091_s4, %s6187_s2 }
 0x938   : > { %p4430_p10 = scmp.lt.u32.totalorder %s4428_s25, %s4424_s18  ;;  %p4432_p12 = scmp.lt.u32.totalorder %s4424_s18, %s6091_s4 }
 0x939   : > { %p4426_p7 = pnand %p4425_p4, %p4617_p5 }
 0x93a   : > { %p4431_p11 = por %p4430_p10, %p4429_p9 }
 0x93b   : > { %p4427_p8 = pneg %p4426_p7 }
 0x93c   : > { %p4433_p13 = por %p4432_p12, %p4431_p11 }
 0x93e   : > { %p4434_p0 = pnand %p4433_p13, %p4427_p8 }
 0x940   : > { %4437 = shalt.err (!%p4434_p0)
}
 0x941   : > { %4367 = dma.vmem_to_hbm [thread:$0]  (%p4617_p5), %s6093_s22, 16, %s6091_s4, %s3209_s0  }
 0x942 PF: > { %s6188_s5 = sld [smem:[#allocation7_spill]]  ;;  %s6189_s26 = sld [smem:[#allocation5_spill]] }
 0x948   : > { %p4373_p1 = scmp.ge.s32.totalorder %s6188_s5, 2  ;;  %s3233_s21 = sand.u32 1, %s6189_s26  }
 0x949   : > { %s3234_s24 = scalar_lea.sflag [#allocation3], %s3233_s21 }
 0x94a   : > { %p4370_p2 = pnand %p4373_p1, %p4621_p6 }
 0x94c   : > { %4455 = dma.done.wait (!%p4370_p2), %s3234_s24, 16  }
 0x94d   : > { %4457 = vsyncadd (!%p4370_p2), %s3234_s24, 4294967280  ;;  %s6191_s21 = sld [smem:[#allocation8_spill]]  ;;  %s6192_s18 = sld [smem:[#allocation6_spill]] }
 0x94e   : > { %s6193_s20 = sld [smem:[#allocation9_spill]]  ;;  %s6194_s0 = smov %s4464_s30 }
 0x953   : > { %p29_p3 = scmp.ge.s32.totalorder %s6191_s21, 4   ;;  %s6195_s30 = smov %s6192_s18 }
 0x955   :  { %31 = sbr.rel (!%p29_p3) target bundleno = 12 (0xc), region = 143 }
 0x95c   :  { %3238 = vsyncpa [#allocation3], 1 }
 0x95d   :  { %3240 = vsyncpa [#allocation3 + $0x1], 1 }

</bundles_post_ra>
